<compile_context>
chip_gen: v6e
topology: v6e:2x2x1
jax: 0.10.0
libtpu: 0.0.40
codegen_flags: <defaults>
</compile_context>

<pallas_src>
import math
from functools import partial

import jax
import jax.numpy as jnp
from jax.experimental import pallas as pl
from jax.experimental.pallas import tpu as pltpu

C = 80                                # SAFA channel width (c=80)
LANE = 128                            # pad every channel dim to a multiple of 128
VMEM_LIMIT = 48 * 1024 * 1024         # generous, still < v7x 64 MiB per core


def _rup(n, m=LANE):
    return ((n + m - 1) // m) * m


# ----------------------------------------------------------------------------
# Fused conv-stack Pallas kernel.
#   Executes a chain of conv layers (1x1 or 3x3, stride 1, pad = (K-1)//2) with
#   all intermediate activations resident on chip.  Modes:
#     'plain' : conv + bias
#     'prelu' : conv + bias + PReLU
#     'res'   : PReLU(conv + bias) * beta + skip(2 layers back)  (Resblock tail)
# ----------------------------------------------------------------------------
@partial(jax.jit, static_argnames=("meta",))
def _fused_stack_call(x, flat, meta):
    nsplit, layer_meta = meta
    N, H, W, cin0 = x.shape
    Nc = N // nsplit
    M = Nc * H * W
    cmax = max([cin for (_, kk, cin, _) in layer_meta if kk == 9], default=0)
    cout_last = layer_meta[-1][3]

    def _const_spec(a):
        nd = a.ndim
        return pl.BlockSpec(a.shape, lambda i, nd=nd: (0,) * nd)

    in_specs = [pl.BlockSpec((Nc, H, W, cin0), lambda i: (i, 0, 0, 0))]
    in_specs += [_const_spec(a) for a in flat]
    out_spec = pl.BlockSpec((Nc, H, W, cout_last), lambda i: (i, 0, 0, 0))

    scratch = []
    if cmax > 0:  # padded (halo) buffer reused by every 3x3 layer
        scratch.append(pltpu.VMEM((Nc, H + 2, W + 2, cmax), jnp.float32))

    def kernel(*refs):
        it = iter(refs)
        x_ref = next(it)
        lrefs = []
        for (mode, kk, cin, cout) in layer_meta:
            d = {"w": next(it), "b": next(it)}
            if mode in ("prelu", "res"):
                d["alpha"] = next(it)
            if mode == "res":
                d["beta"] = next(it)
            lrefs.append(d)
        o_ref = next(it)
        pad_ref = next(it, None)

        if pad_ref is not None:
            # Zero only the halo border; the interior is fully overwritten by
            # every 3x3 layer and only channels [0:cin] are ever read back.
            Hp, Wp = H + 2, W + 2
            z_row = jnp.zeros((Nc, 1, Wp, cmax), jnp.float32)
            z_col = jnp.zeros((Nc, Hp, 1, cmax), jnp.float32)
            pad_ref[:, 0:1, :, :] = z_row
            pad_ref[:, H + 1:Hp, :, :] = z_row
            pad_ref[:, :, 0:1, :] = z_col
            pad_ref[:, :, W + 1:Wp, :] = z_col

        # activations carried as (M, C) f32 values, fed to the MXU as bf16
        a_prev = None
        a_cur = x_ref[...].reshape(M, cin0)
        nl = len(layer_meta)
        for li, ((mode, kk, cin, cout), r) in enumerate(zip(layer_meta, lrefs)):
            if kk == 1:
                lhs = a_cur.astype(jnp.bfloat16)
                acc = jnp.dot(lhs, r["w"][0], preferred_element_type=jnp.float32)
            else:
                pad_ref[:, 1:H + 1, 1:W + 1, 0:cin] = a_cur.reshape(Nc, H, W, cin)
                acc = None
                for t in range(9):
                    ky, kx = divmod(t, 3)
                    patch = pad_ref[:, ky:ky + H, kx:kx + W, 0:cin]
                    patch = patch.reshape(M, cin).astype(jnp.bfloat16)
                    d = jnp.dot(patch, r["w"][t],
                                preferred_element_type=jnp.float32)
                    acc = d if acc is None else acc + d
            acc = acc + r["b"][...]
            if mode == "prelu":
                acc = jnp.where(acc >= 0, acc, acc * r["alpha"][...])
            elif mode == "res":
                acc = acc * r["beta"][...] + a_prev
                acc = jnp.where(acc >= 0, acc, acc * r["alpha"][...])
            if li == nl - 1:
                o_ref[...] = acc.reshape(Nc, H, W, cout)
            else:
                a_prev, a_cur = a_cur, acc

    return pl.pallas_call(
        kernel,
        out_shape=jax.ShapeDtypeStruct((N, H, W, cout_last), jnp.float32),
        grid=(nsplit,),
        in_specs=in_specs,
        out_specs=out_spec,
        scratch_shapes=scratch,
        compiler_params=pltpu.CompilerParams(
            dimension_semantics=("parallel",),
            vmem_limit_bytes=VMEM_LIMIT),
    )(x, *flat)


def run_stack(x, specs):
    """x: (N,H,W,Ctrue) f32.  specs: list of (prepared_conv_params, mode)."""
    layer_meta, flat = [], []
    prev_cout = None
    for p, mode in specs:
        kk, cin, cout = p["w"].shape
        if prev_cout is not None:
            assert prev_cout == cin, "layer chain channel mismatch"
        prev_cout = cout
        flat += [p["w"], p["b"]]
        if mode in ("prelu", "res"):
            flat.append(p["alpha"])
        if mode == "res":
            flat.append(p["beta"])
        layer_meta.append((mode, kk, cin, cout))
    cin0 = layer_meta[0][2]
    c = x.shape[-1]
    assert c <= cin0
    if c < cin0:
        x = jnp.pad(x, ((0, 0),) * (x.ndim - 1) + ((0, cin0 - c),))
    x = x.astype(jnp.float32)
    N = x.shape[0]
    nsplit = 2 if (N % 2 == 0 and N >= 2) else 1
    return _fused_stack_call(x, tuple(flat), meta=(nsplit, tuple(layer_meta)))


# ----------------------------------------------------------------------------
# getscale: 1x1 conv + PReLU, 1x1 stride-2 conv + PReLU, global-avg-pool,
# Linear, Sigmoid -- all fused in one kernel (pooling via a tiny matmul).
# Since both convs are 1x1, conv1 + subsample == subsample + conv1, so the
# stride-2 subsample is done once in JAX on the input.
# ----------------------------------------------------------------------------
@jax.jit
def _getscale_call(xs, pool, w1, b1, a1, w2, b2, a2, wf, bf_):
    N, hs, ws, cp = xs.shape
    S = hs * ws
    cf = wf.shape[2]

    def kernel(x_ref, p_ref, w1r, b1r, a1r, w2r, b2r, a2r, wfr, bfr, o_ref):
        flat = x_ref[...].reshape(N * S, cp).astype(jnp.bfloat16)
        y = jnp.dot(flat, w1r[0], preferred_element_type=jnp.float32) + b1r[...]
        y = jnp.where(y >= 0, y, y * a1r[...])
        y = jnp.dot(y.astype(jnp.bfloat16), w2r[0],
                    preferred_element_type=jnp.float32) + b2r[...]
        y = jnp.where(y >= 0, y, y * a2r[...])
        pooled = jnp.dot(p_ref[...], y.astype(jnp.bfloat16),
                         preferred_element_type=jnp.float32)
        lg = jnp.dot(pooled.astype(jnp.bfloat16), wfr[0],
                     preferred_element_type=jnp.float32) + bfr[...]
        o_ref[...] = 1.0 / (1.0 + jnp.exp(-lg))

    return pl.pallas_call(
        kernel,
        out_shape=jax.ShapeDtypeStruct((N, cf), jnp.float32),
        compiler_params=pltpu.CompilerParams(vmem_limit_bytes=VMEM_LIMIT),
    )(xs, pool, w1, b1, a1, w2, b2, a2, wf, bf_)


def getscale_fn(gp, x):
    xs = x[:, ::2, ::2, :]                         # stride-2 of a 1x1 conv chain
    cin_p = gp["c1"]["w"].shape[1]
    c = xs.shape[-1]
    if c < cin_p:
        xs = jnp.pad(xs, ((0, 0), (0, 0), (0, 0), (0, cin_p - c)))
    N, hs, ws, _ = xs.shape
    S = hs * ws
    pool = (jnp.repeat(jnp.eye(N, dtype=jnp.float32), S, axis=1) / S)
    out = _getscale_call(xs.astype(jnp.float32), pool.astype(jnp.bfloat16),
                         gp["c1"]["w"], gp["c1"]["b"], gp["c1"]["alpha"],
                         gp["c2"]["w"], gp["c2"]["b"], gp["c2"]["alpha"],
                         gp["fc"]["w"], gp["fc"]["b"])
    return out[:, :2]


# ----------------------------------------------------------------------------
# Plain-JAX glue: bilinear resize (align_corners=False), backward warp
# (bilinear/border), PixelShuffle, space-to-depth for stride-2 convs.
# TODO(synk): these gather/scatter ops stay in JAX; no clean static-index
#             Pallas equivalent without manual DMA gather.
# ----------------------------------------------------------------------------
def interpolate(x, scale):
    B, H, W, Cc = x.shape
    Ho, Wo = int(math.floor(H * scale)), int(math.floor(W * scale))

    def src(o, i):
        c = (jnp.arange(o, dtype=jnp.float32) + 0.5) * (i / o) - 0.5
        c = jnp.maximum(c, 0.0)
        lo = jnp.floor(c)
        frac = c - lo
        lo = jnp.minimum(lo.astype(jnp.int32), i - 1)
        hi = jnp.minimum(lo + 1, i - 1)
        return lo, hi, frac

    ylo, yhi, fy = src(Ho, H)
    xlo, xhi, fx = src(Wo, W)
    top, bot = x[:, ylo, :, :], x[:, yhi, :, :]

    def mix_w(r):
        return (r[:, :, xlo, :] * (1 - fx)[None, None, :, None]
                + r[:, :, xhi, :] * fx[None, None, :, None])

    t, bm = mix_w(top), mix_w(bot)
    return t * (1 - fy)[None, :, None, None] + bm * fy[None, :, None, None]


def warp(img, flow):
    B, H, W, Cc = img.shape
    gy = jnp.arange(H, dtype=jnp.float32)[None, :, None]
    gx = jnp.arange(W, dtype=jnp.float32)[None, None, :]
    fx = jnp.clip(gx + flow[..., 0], 0.0, W - 1.0)
    fy = jnp.clip(gy + flow[..., 1], 0.0, H - 1.0)
    x0 = jnp.floor(fx)
    y0 = jnp.floor(fy)
    wx = (fx - x0)[..., None]
    wy = (fy - y0)[..., None]
    x0 = x0.astype(jnp.int32)
    y0 = y0.astype(jnp.int32)
    x1 = jnp.minimum(x0 + 1, W - 1)
    y1 = jnp.minimum(y0 + 1, H - 1)
    flat = img.reshape(B, H * W, Cc)

    def gather(yy, xx):
        idx = (yy * W + xx).reshape(B, H * W)
        return jax.vmap(lambda f, i: f[i, :])(flat, idx).reshape(B, H, W, Cc)

    v00, v01 = gather(y0, x0), gather(y0, x1)
    v10, v11 = gather(y1, x0), gather(y1, x1)
    return (v00 * (1 - wx) * (1 - wy) + v01 * wx * (1 - wy)
            + v10 * (1 - wx) * wy + v11 * wx * wy)


def pixel_shuffle(x, r):
    B, H, W, Cc = x.shape
    c = Cc // (r * r)
    x = x.reshape(B, H, W, c, r, r)
    x = jnp.transpose(x, (0, 1, 4, 2, 5, 3))
    return x.reshape(B, H * r, W * r, c)


def _space_to_depth_s2(x):
    """im2col for a 3x3 / stride-2 / pad-1 conv: (N,H,W,C) -> (N,H//2,W//2,9C)."""
    N, H, W, Cc = x.shape
    xp = jnp.pad(x, ((0, 0), (1, 1), (1, 1), (0, 0)))
    Ho, Wo = H // 2, W // 2
    taps = [xp[:, ky:ky + 2 * Ho:2, kx:kx + 2 * Wo:2, :]
            for ky in range(3) for kx in range(3)]
    return jnp.concatenate(taps, axis=-1)


# ----------------------------------------------------------------------------
# Model components
# ----------------------------------------------------------------------------
def head_fn(hp, imgs):
    # TODO(synk): Head(c) architecture is not given in the snippet; using
    # conv(3,c,3,2,1)+PReLU followed by conv(c,c,3,1,1)+PReLU (half-res, c ch).
    patches = _space_to_depth_s2(imgs)                       # stride-2 -> 1x1
    y = run_stack(patches, [(hp["c0"], "prelu"), (hp["c1"], "prelu")])
    return y[..., :C]


def backbone_fn(bp, x):
    specs = [(bp["stem"], "prelu")]
    for rb in bp["res"]:
        specs += [(rb["conv1"], "prelu"), (rb["conv2"], "res")]
    return run_stack(x, specs)[..., :C]


def convflow_fn(pc, feat):
    y = run_stack(feat, [(pc, "plain")])[..., :24]
    return pixel_shuffle(y, 2)


def lastconv_fn(lp, x):
    patches = _space_to_depth_s2(x)                          # (N,4,4,9*(2C+1))
    specs = [(lp["c0"], "prelu")]
    for rb in lp["res"][:4]:
        specs += [(rb["conv1"], "prelu"), (rb["conv2"], "res")]
    y = run_stack(patches, specs)                            # (N,4,4,128)
    specs = []
    for rb in lp["res"][4:8]:
        specs += [(rb["conv1"], "prelu"), (rb["conv2"], "res")]
    y = run_stack(y, specs)
    specs = []
    for rb in lp["res"][8:12]:
        specs += [(rb["conv1"], "prelu"), (rb["conv2"], "res")]
    specs.append((lp["c13"], "prelu"))
    y = run_stack(y, specs)                                  # (N,4,4,256)
    y = pixel_shuffle(y[..., :2 * C], 2)                     # (N,8,8,40)
    y = run_stack(y, [(lp["cfinal"], "plain")])[..., :12]
    return pixel_shuffle(y, 2)                               # (N,16,16,3)


def extract_feat(fp, lowres):
    B = lowres.shape[0]
    imgs = jnp.concatenate([lowres[..., :3], lowres[..., 3:6]], axis=0)
    h = head_fn(fp["head"], imgs)
    i0, i1 = h[:B], h[B:]
    feat = run_stack(jnp.concatenate([i0, i1], axis=-1),
                     [(fp["shuffle"], "prelu")])[..., :C]
    return feat, i0, i1


def recurrent_block(bp, fp, x_feat, i0, i1, flow, timestep, key):
    flow_down = interpolate(flow, 0.5)
    w0 = warp(i0, flow_down[..., 0:2] * 0.5)
    w1 = warp(i1, flow_down[..., 2:4] * 0.5)
    x = jnp.concatenate([x_feat, flow_down, w0, w1, timestep], axis=-1)

    s_soft = getscale_fn(fp["getscale"], x)                       # (N,2)
    scale = jax.random.bernoulli(key, s_soft).astype(jnp.float32)  # RoundSTE fwd
    scale = scale[:, None, None, :]                                # (N,1,1,2)

    # batch != 1 -> torch evaluates all three scale branches (our batch is 18).
    x0 = backbone_fn(bp, x)
    x1 = interpolate(backbone_fn(bp, interpolate(x, 0.5)), 2.0)
    x2 = interpolate(backbone_fn(bp, interpolate(x, 0.25)), 4.0)
    s0, s1 = scale[..., 0:1], scale[..., 1:2]
    feat = x0 * s0 * s1 + x1 * (1.0 - s0) * s1 + x2 * (1.0 - s1)

    flow_new = convflow_fn(fp["convflow"], feat) + flow
    return feat, flow_new, w0, w1, scale


def flownet_forward(fp, i0, i1, feat, ts, flow, key):
    flow_list, feat_list, scale_list = [], [], []
    for bp in fp["blocks"]:
        key, sub = jax.random.split(key)
        feat, flow, _, _, scale = recurrent_block(bp, fp, feat, i0, i1, flow,
                                                  ts, sub)
        flow_list.append(flow)
        feat_list.append(feat)
        scale_list.append(scale)
    return flow_list, feat_list, jnp.concatenate(scale_list, axis=-1)


def safa_forward(params, lowres, timestep, key):
    B, H, W, _ = lowres.shape
    img0, img1 = lowres[..., :3], lowres[..., 3:6]

    ts = jnp.full((B, H, W, 1), timestep, jnp.float32)
    ts = interpolate(ts, 0.5)
    one = jnp.ones_like(ts)
    ts_list = [ts * 0.0] + [one * (i / 8.0) for i in range(1, 8)] + [one]
    T = len(ts_list)                                    # 9 timesteps
    ts_all = jnp.concatenate(ts_list, axis=0)           # (T*B, H/2, W/2, 1)

    feat0, i0, i1 = extract_feat(params["block"], lowres)

    rep = lambda a: jnp.tile(a, (T,) + (1,) * (a.ndim - 1))
    i0b, i1b, featb = rep(i0), rep(i1), rep(feat0)
    img0b, img1b = rep(img0), rep(img1)
    flow0 = jnp.zeros((T * B, H, W, 6), jnp.float32)

    # all 9 timesteps are independent -> run the whole Flownet once on batch T*B
    flow_list, _, soft_scale = flownet_forward(
        params["block"], i0b, i1b, featb, ts_all, flow0, key)

    flow_sum = flow_list[-1]
    w_i0 = warp(img0b, flow_sum[..., 0:2])
    w_i1 = warp(img1b, flow_sum[..., 2:4])
    mask = jax.nn.sigmoid(flow_sum[..., 4:5])
    warped = w_i0 * mask + w_i1 * (1.0 - mask)
    flow_down = interpolate(flow_sum, 0.5)
    w0 = warp(i0b, flow_down[..., 0:2] * 0.5)
    w1 = warp(i1b, flow_down[..., 2:4] * 0.5)
    img = lastconv_fn(params["lastconv"], jnp.concatenate([ts_all, w0, w1], -1))
    merged_all = jnp.clip(warped + img, 0.0, 1.0)              # (T*B,H,W,3)

    merged = [merged_all[t * B:(t + 1) * B] for t in range(T)]
    last = slice((T - 1) * B, T * B)                           # last timestep
    flow_cat = jnp.concatenate([f[last] for f in flow_list] + [flow_sum[last]],
                               axis=2)                          # torch cat dim 3
    soft_scale_t1 = soft_scale[B:2 * B]                         # timestep index 1
    return flow_cat, soft_scale_t1, merged


# ----------------------------------------------------------------------------
# Parameter init (raw, torch-equivalent shapes) + prep (lane-padded, bf16).
# ----------------------------------------------------------------------------
def init_params(key, c=80, block_num=6, depth=2):
    keys = iter(jax.random.split(key, 1024))
    nk = lambda: next(keys)

    def conv_p(K, cin, cout, prelu=True, beta=False):
        p = {"w": jax.random.normal(nk(), (K * K, cin, cout), jnp.float32)
                  / math.sqrt(K * K * cin),
             "b": jnp.zeros((cout,), jnp.float32)}
        if prelu:
            p["alpha"] = jnp.full((cout,), 0.25, jnp.float32)   # nn.PReLU init
        if beta:
            p["beta"] = jnp.zeros((cout,), jnp.float32)         # Resblock.beta
        return p

    def resblock_p(cc):
        return {"conv1": conv_p(3, cc, cc, prelu=True),
                "conv2": conv_p(3, cc, cc, prelu=True, beta=True)}

    block = {
        "head": {"c0": conv_p(3, 3, c), "c1": conv_p(3, c, c)},
        "shuffle": conv_p(3, 2 * c, c),
        "convflow": conv_p(3, c, 4 * 6, prelu=False),
        "getscale": {"c1": conv_p(1, 3 * c + 7, c),
                     "c2": conv_p(1, c, c),
                     "fc": conv_p(1, c, 2, prelu=False)},
        "blocks": [{"stem": conv_p(3, 3 * c + 7, c),
                    "res": [resblock_p(c) for _ in range(depth)]}
                   for _ in range(block_num)],
    }
    lastconv = {
        "c0": conv_p(3, 2 * c + 1, c),
        "res": [resblock_p(c) for _ in range(12)],
        "c13": conv_p(3, c, 2 * c),
        "cfinal": conv_p(3, c // 2, 12, prelu=False),
    }
    return {"block": block, "lastconv": lastconv}


def prep_conv(p, im2col=False):
    """Pad channels to 128 multiples, weights -> bf16, vectors -> (1, Cpad) f32."""
    w = p["w"]
    kk, cin, cout = w.shape
    if im2col:                       # stride-2 conv handled as 1x1 on im2col input
        w = w.reshape(1, kk * cin, cout)
        kk, cin = 1, kk * cin
    cin_p, cout_p = _rup(cin), _rup(cout)
    wp = jnp.zeros((kk, cin_p, cout_p), jnp.float32)
    wp = wp.at[:, :cin, :cout].set(w).astype(jnp.bfloat16)
    out = {"w": wp,
           "b": jnp.zeros((1, cout_p), jnp.float32).at[0, :cout].set(p["b"])}
    if "alpha" in p:
        out["alpha"] = jnp.zeros((1, cout_p), jnp.float32).at[0, :cout].set(p["alpha"])
    if "beta" in p:
        out["beta"] = jnp.zeros((1, cout_p), jnp.float32).at[0, :cout].set(p["beta"])
    return out


def prepare_params(raw):
    P = prep_conv
    blk = raw["block"]
    block = {
        "head": {"c0": P(blk["head"]["c0"], im2col=True), "c1": P(blk["head"]["c1"])},
        "shuffle": P(blk["shuffle"]),
        "convflow": P(blk["convflow"]),
        "getscale": {"c1": P(blk["getscale"]["c1"]),
                     "c2": P(blk["getscale"]["c2"]),
                     "fc": P(blk["getscale"]["fc"])},
        "blocks": [{"stem": P(bp["stem"]),
                    "res": [{"conv1": P(rb["conv1"]), "conv2": P(rb["conv2"])}
                            for rb in bp["res"]]}
                   for bp in blk["blocks"]],
    }
    lc = raw["lastconv"]
    lastconv = {"c0": P(lc["c0"], im2col=True),
                "res": [{"conv1": P(rb["conv1"]), "conv2": P(rb["conv2"])}
                        for rb in lc["res"]],
                "c13": P(lc["c13"]),
                "cfinal": P(lc["cfinal"])}
    return {"block": block, "lastconv": lastconv}


if __name__ == "__main__":
    root = jax.random.PRNGKey(0)
    pkey, dkey, bkey = jax.random.split(root, 3)

    params = prepare_params(init_params(pkey))
    # lowres: NHWC (2,16,16,6)  <->  torch NCHW (2,6,16,16)
    lowres = jax.random.uniform(dkey, (2, 16, 16, 6), jnp.float32)

    fwd = jax.jit(safa_forward)
    flow_cat, soft_scale, merged = fwd(params, lowres, 0.5, bkey)
    jax.block_until_ready((flow_cat, soft_scale, merged))

    assert flow_cat.shape == (2, 16, 16 * 7, 6)      # torch: (2, 6, 16, 112)
    assert soft_scale.shape == (2, 1, 1, 12)         # torch: (2, 12, 1, 1)
    assert len(merged) == 9 and merged[0].shape == (2, 16, 16, 3)
    print("KERNEL_OK")
</pallas_src>

<mosaic_0001>
module attributes {stable_mosaic.version = 11 : i64} {
  func.func @kernel(%arg0: i32, %arg1: memref<2x8x8x128xf32, #tpu.memory_space<vmem>>, %arg2: memref<1x128x128xbf16, #tpu.memory_space<vmem>>, %arg3: memref<1x128xf32, #tpu.memory_space<vmem>>, %arg4: memref<1x128xf32, #tpu.memory_space<vmem>>, %arg5: memref<9x128x128xbf16, #tpu.memory_space<vmem>>, %arg6: memref<1x128xf32, #tpu.memory_space<vmem>>, %arg7: memref<1x128xf32, #tpu.memory_space<vmem>>, %arg8: memref<2x8x8x128xf32, #tpu.memory_space<vmem>>, %arg9: memref<2x10x10x128xf32, #tpu.memory_space<vmem>>) attributes {dimension_semantics = [#tpu.dimension_semantics<parallel>], iteration_bounds = array<i64: 2>, scalar_prefetch = 0 : i64, scratch_operands = 1 : i64, tpu.core_type = #tpu.core_type<tc>, window_params = [{transform_indices = @transform_0, window_bounds = array<i64: 2, 8, 8, 128>}, {pipeline_mode = #tpu.pipeline_mode<synchronous>, transform_indices = @transform_1, window_bounds = array<i64: 1, 128, 128>}, {pipeline_mode = #tpu.pipeline_mode<synchronous>, transform_indices = @transform_2, window_bounds = array<i64: 1, 128>}, {pipeline_mode = #tpu.pipeline_mode<synchronous>, transform_indices = @transform_3, window_bounds = array<i64: 1, 128>}, {pipeline_mode = #tpu.pipeline_mode<synchronous>, transform_indices = @transform_4, window_bounds = array<i64: 9, 128, 128>}, {pipeline_mode = #tpu.pipeline_mode<synchronous>, transform_indices = @transform_5, window_bounds = array<i64: 1, 128>}, {pipeline_mode = #tpu.pipeline_mode<synchronous>, transform_indices = @transform_6, window_bounds = array<i64: 1, 128>}, {transform_indices = @transform_7, window_bounds = array<i64: 2, 8, 8, 128>}]} {
    %cst = arith.constant 0.000000e+00 : f32
    %0 = vector.broadcast %cst : f32 to vector<2x1x10x128xf32>
    %cst_0 = arith.constant 0.000000e+00 : f32
    %1 = vector.broadcast %cst_0 : f32 to vector<2x10x1x128xf32>
    %c0 = arith.constant 0 : index
    %c0_1 = arith.constant 0 : index
    %c0_2 = arith.constant 0 : index
    %c0_3 = arith.constant 0 : index
    %2 = vector.load %arg9[%c0, %c0_1, %c0_2, %c0_3] : memref<2x10x10x128xf32, #tpu.memory_space<vmem>>, vector<2x1x10x128xf32>
    tpu.vector_store %arg9[%c0, %c0_1, %c0_2, %c0_3], %0 {strides = array<i32>} : memref<2x10x10x128xf32, #tpu.memory_space<vmem>>, vector<2x1x10x128xf32>,
    %c0_4 = arith.constant 0 : index
    %c9 = arith.constant 9 : index
    %c0_5 = arith.constant 0 : index
    %c0_6 = arith.constant 0 : index
    %3 = vector.load %arg9[%c0_4, %c9, %c0_5, %c0_6] : memref<2x10x10x128xf32, #tpu.memory_space<vmem>>, vector<2x1x10x128xf32>
    tpu.vector_store %arg9[%c0_4, %c9, %c0_5, %c0_6], %0 {strides = array<i32>} : memref<2x10x10x128xf32, #tpu.memory_space<vmem>>, vector<2x1x10x128xf32>,
    %c0_7 = arith.constant 0 : index
    %c0_8 = arith.constant 0 : index
    %c0_9 = arith.constant 0 : index
    %c0_10 = arith.constant 0 : index
    %4 = vector.load %arg9[%c0_7, %c0_8, %c0_9, %c0_10] : memref<2x10x10x128xf32, #tpu.memory_space<vmem>>, vector<2x10x1x128xf32>
    tpu.vector_store %arg9[%c0_7, %c0_8, %c0_9, %c0_10], %1 {strides = array<i32>} : memref<2x10x10x128xf32, #tpu.memory_space<vmem>>, vector<2x10x1x128xf32>,
    %c0_11 = arith.constant 0 : index
    %c0_12 = arith.constant 0 : index
    %c9_13 = arith.constant 9 : index
    %c0_14 = arith.constant 0 : index
    %5 = vector.load %arg9[%c0_11, %c0_12, %c9_13, %c0_14] : memref<2x10x10x128xf32, #tpu.memory_space<vmem>>, vector<2x10x1x128xf32>
    tpu.vector_store %arg9[%c0_11, %c0_12, %c9_13, %c0_14], %1 {strides = array<i32>} : memref<2x10x10x128xf32, #tpu.memory_space<vmem>>, vector<2x10x1x128xf32>,
    %c0_15 = arith.constant 0 : index
    %c0_16 = arith.constant 0 : index
    %c0_17 = arith.constant 0 : index
    %c0_18 = arith.constant 0 : index
    %6 = vector.load %arg1[%c0_15, %c0_16, %c0_17, %c0_18] : memref<2x8x8x128xf32, #tpu.memory_space<vmem>>, vector<2x8x8x128xf32>
    %7 = vector.shape_cast %6 : vector<2x8x8x128xf32> to vector<128x128xf32>
    %8 = arith.truncf %7 : vector<128x128xf32> to vector<128x128xbf16>
    %c0_19 = arith.constant 0 : index
    %c0_20 = arith.constant 0 : index
    %c0_21 = arith.constant 0 : index
    %9 = vector.load %arg2[%c0_19, %c0_20, %c0_21] : memref<1x128x128xbf16, #tpu.memory_space<vmem>>, vector<1x128x128xbf16>
    %10 = vector.shape_cast %9 : vector<1x128x128xbf16> to vector<128x128xbf16>
    %cst_22 = arith.constant dense<0.000000e+00> : vector<128x128xf32>
    %11 = tpu.matmul %8, %10, %cst_22 {dimension_numbers = #tpu.dot_dimension_numbers<[1], [0], [0], [1], [0, 0, 1, 1], [], []>} : vector<128x128xbf16>, vector<128x128xbf16>, vector<128x128xf32> -> vector<128x128xf32>
    %c0_23 = arith.constant 0 : index
    %c0_24 = arith.constant 0 : index
    %12 = vector.load %arg3[%c0_23, %c0_24] : memref<1x128xf32, #tpu.memory_space<vmem>>, vector<1x128xf32>
    %13 = vector.broadcast %12 : vector<1x128xf32> to vector<128x128xf32>
    %14 = arith.addf %11, %13 : vector<128x128xf32>
    %cst_25 = arith.constant 0.000000e+00 : f32
    %15 = vector.broadcast %cst_25 : f32 to vector<128x128xf32>
    %16 = arith.cmpf oge, %14, %15 : vector<128x128xf32>
    %c0_26 = arith.constant 0 : index
    %c0_27 = arith.constant 0 : index
    %17 = vector.load %arg4[%c0_26, %c0_27] : memref<1x128xf32, #tpu.memory_space<vmem>>, vector<1x128xf32>
    %18 = vector.broadcast %17 : vector<1x128xf32> to vector<128x128xf32>
    %19 = arith.mulf %14, %18 : vector<128x128xf32>
    %20 = arith.select %16, %14, %19 : vector<128x128xi1>, vector<128x128xf32>
    %21 = vector.shape_cast %20 : vector<128x128xf32> to vector<2x8x8x128xf32>
    %c0_28 = arith.constant 0 : index
    %c1 = arith.constant 1 : index
    %c1_29 = arith.constant 1 : index
    %c0_30 = arith.constant 0 : index
    %22 = vector.load %arg9[%c0_28, %c1, %c1_29, %c0_30] : memref<2x10x10x128xf32, #tpu.memory_space<vmem>>, vector<2x8x8x128xf32>
    tpu.vector_store %arg9[%c0_28, %c1, %c1_29, %c0_30], %21 {strides = array<i32>} : memref<2x10x10x128xf32, #tpu.memory_space<vmem>>, vector<2x8x8x128xf32>,
    %c0_31 = arith.constant 0 : index
    %c0_32 = arith.constant 0 : index
    %c0_33 = arith.constant 0 : index
    %c0_34 = arith.constant 0 : index
    %23 = vector.load %arg9[%c0_31, %c0_32, %c0_33, %c0_34] : memref<2x10x10x128xf32, #tpu.memory_space<vmem>>, vector<2x8x8x128xf32>
    %24 = vector.shape_cast %23 : vector<2x8x8x128xf32> to vector<128x128xf32>
    %25 = arith.truncf %24 : vector<128x128xf32> to vector<128x128xbf16>
    %c0_35 = arith.constant 0 : index
    %c0_36 = arith.constant 0 : index
    %c0_37 = arith.constant 0 : index
    %26 = vector.load %arg5[%c0_35, %c0_36, %c0_37] : memref<9x128x128xbf16, #tpu.memory_space<vmem>>, vector<1x128x128xbf16>
    %27 = vector.shape_cast %26 : vector<1x128x128xbf16> to vector<128x128xbf16>
    %cst_38 = arith.constant dense<0.000000e+00> : vector<128x128xf32>
    %28 = tpu.matmul %25, %27, %cst_38 {dimension_numbers = #tpu.dot_dimension_numbers<[1], [0], [0], [1], [0, 0, 1, 1], [], []>} : vector<128x128xbf16>, vector<128x128xbf16>, vector<128x128xf32> -> vector<128x128xf32>
    %c0_39 = arith.constant 0 : index
    %c0_40 = arith.constant 0 : index
    %c1_41 = arith.constant 1 : index
    %c0_42 = arith.constant 0 : index
    %29 = vector.load %arg9[%c0_39, %c0_40, %c1_41, %c0_42] : memref<2x10x10x128xf32, #tpu.memory_space<vmem>>, vector<2x8x8x128xf32>
    %30 = vector.shape_cast %29 : vector<2x8x8x128xf32> to vector<128x128xf32>
    %31 = arith.truncf %30 : vector<128x128xf32> to vector<128x128xbf16>
    %c1_43 = arith.constant 1 : index
    %c0_44 = arith.constant 0 : index
    %c0_45 = arith.constant 0 : index
    %32 = vector.load %arg5[%c1_43, %c0_44, %c0_45] : memref<9x128x128xbf16, #tpu.memory_space<vmem>>, vector<1x128x128xbf16>
    %33 = vector.shape_cast %32 : vector<1x128x128xbf16> to vector<128x128xbf16>
    %cst_46 = arith.constant dense<0.000000e+00> : vector<128x128xf32>
    %34 = tpu.matmul %31, %33, %cst_46 {dimension_numbers = #tpu.dot_dimension_numbers<[1], [0], [0], [1], [0, 0, 1, 1], [], []>} : vector<128x128xbf16>, vector<128x128xbf16>, vector<128x128xf32> -> vector<128x128xf32>
    %35 = arith.addf %28, %34 : vector<128x128xf32>
    %c0_47 = arith.constant 0 : index
    %c0_48 = arith.constant 0 : index
    %c2 = arith.constant 2 : index
    %c0_49 = arith.constant 0 : index
    %36 = vector.load %arg9[%c0_47, %c0_48, %c2, %c0_49] : memref<2x10x10x128xf32, #tpu.memory_space<vmem>>, vector<2x8x8x128xf32>
    %37 = vector.shape_cast %36 : vector<2x8x8x128xf32> to vector<128x128xf32>
    %38 = arith.truncf %37 : vector<128x128xf32> to vector<128x128xbf16>
    %c2_50 = arith.constant 2 : index
    %c0_51 = arith.constant 0 : index
    %c0_52 = arith.constant 0 : index
    %39 = vector.load %arg5[%c2_50, %c0_51, %c0_52] : memref<9x128x128xbf16, #tpu.memory_space<vmem>>, vector<1x128x128xbf16>
    %40 = vector.shape_cast %39 : vector<1x128x128xbf16> to vector<128x128xbf16>
    %cst_53 = arith.constant dense<0.000000e+00> : vector<128x128xf32>
    %41 = tpu.matmul %38, %40, %cst_53 {dimension_numbers = #tpu.dot_dimension_numbers<[1], [0], [0], [1], [0, 0, 1, 1], [], []>} : vector<128x128xbf16>, vector<128x128xbf16>, vector<128x128xf32> -> vector<128x128xf32>
    %42 = arith.addf %35, %41 : vector<128x128xf32>
    %c0_54 = arith.constant 0 : index
    %c1_55 = arith.constant 1 : index
    %c0_56 = arith.constant 0 : index
    %c0_57 = arith.constant 0 : index
    %43 = vector.load %arg9[%c0_54, %c1_55, %c0_56, %c0_57] : memref<2x10x10x128xf32, #tpu.memory_space<vmem>>, vector<2x8x8x128xf32>
    %44 = vector.shape_cast %43 : vector<2x8x8x128xf32> to vector<128x128xf32>
    %45 = arith.truncf %44 : vector<128x128xf32> to vector<128x128xbf16>
    %c3 = arith.constant 3 : index
    %c0_58 = arith.constant 0 : index
    %c0_59 = arith.constant 0 : index
    %46 = vector.load %arg5[%c3, %c0_58, %c0_59] : memref<9x128x128xbf16, #tpu.memory_space<vmem>>, vector<1x128x128xbf16>
    %47 = vector.shape_cast %46 : vector<1x128x128xbf16> to vector<128x128xbf16>
    %cst_60 = arith.constant dense<0.000000e+00> : vector<128x128xf32>
    %48 = tpu.matmul %45, %47, %cst_60 {dimension_numbers = #tpu.dot_dimension_numbers<[1], [0], [0], [1], [0, 0, 1, 1], [], []>} : vector<128x128xbf16>, vector<128x128xbf16>, vector<128x128xf32> -> vector<128x128xf32>
    %49 = arith.addf %42, %48 : vector<128x128xf32>
    %c0_61 = arith.constant 0 : index
    %c1_62 = arith.constant 1 : index
    %c1_63 = arith.constant 1 : index
    %c0_64 = arith.constant 0 : index
    %50 = vector.load %arg9[%c0_61, %c1_62, %c1_63, %c0_64] : memref<2x10x10x128xf32, #tpu.memory_space<vmem>>, vector<2x8x8x128xf32>
    %51 = vector.shape_cast %50 : vector<2x8x8x128xf32> to vector<128x128xf32>
    %52 = arith.truncf %51 : vector<128x128xf32> to vector<128x128xbf16>
    %c4 = arith.constant 4 : index
    %c0_65 = arith.constant 0 : index
    %c0_66 = arith.constant 0 : index
    %53 = vector.load %arg5[%c4, %c0_65, %c0_66] : memref<9x128x128xbf16, #tpu.memory_space<vmem>>, vector<1x128x128xbf16>
    %54 = vector.shape_cast %53 : vector<1x128x128xbf16> to vector<128x128xbf16>
    %cst_67 = arith.constant dense<0.000000e+00> : vector<128x128xf32>
    %55 = tpu.matmul %52, %54, %cst_67 {dimension_numbers = #tpu.dot_dimension_numbers<[1], [0], [0], [1], [0, 0, 1, 1], [], []>} : vector<128x128xbf16>, vector<128x128xbf16>, vector<128x128xf32> -> vector<128x128xf32>
    %56 = arith.addf %49, %55 : vector<128x128xf32>
    %c0_68 = arith.constant 0 : index
    %c1_69 = arith.constant 1 : index
    %c2_70 = arith.constant 2 : index
    %c0_71 = arith.constant 0 : index
    %57 = vector.load %arg9[%c0_68, %c1_69, %c2_70, %c0_71] : memref<2x10x10x128xf32, #tpu.memory_space<vmem>>, vector<2x8x8x128xf32>
    %58 = vector.shape_cast %57 : vector<2x8x8x128xf32> to vector<128x128xf32>
    %59 = arith.truncf %58 : vector<128x128xf32> to vector<128x128xbf16>
    %c5 = arith.constant 5 : index
    %c0_72 = arith.constant 0 : index
    %c0_73 = arith.constant 0 : index
    %60 = vector.load %arg5[%c5, %c0_72, %c0_73] : memref<9x128x128xbf16, #tpu.memory_space<vmem>>, vector<1x128x128xbf16>
    %61 = vector.shape_cast %60 : vector<1x128x128xbf16> to vector<128x128xbf16>
    %cst_74 = arith.constant dense<0.000000e+00> : vector<128x128xf32>
    %62 = tpu.matmul %59, %61, %cst_74 {dimension_numbers = #tpu.dot_dimension_numbers<[1], [0], [0], [1], [0, 0, 1, 1], [], []>} : vector<128x128xbf16>, vector<128x128xbf16>, vector<128x128xf32> -> vector<128x128xf32>
    %63 = arith.addf %56, %62 : vector<128x128xf32>
    %c0_75 = arith.constant 0 : index
    %c2_76 = arith.constant 2 : index
    %c0_77 = arith.constant 0 : index
    %c0_78 = arith.constant 0 : index
    %64 = vector.load %arg9[%c0_75, %c2_76, %c0_77, %c0_78] : memref<2x10x10x128xf32, #tpu.memory_space<vmem>>, vector<2x8x8x128xf32>
    %65 = vector.shape_cast %64 : vector<2x8x8x128xf32> to vector<128x128xf32>
    %66 = arith.truncf %65 : vector<128x128xf32> to vector<128x128xbf16>
    %c6 = arith.constant 6 : index
    %c0_79 = arith.constant 0 : index
    %c0_80 = arith.constant 0 : index
    %67 = vector.load %arg5[%c6, %c0_79, %c0_80] : memref<9x128x128xbf16, #tpu.memory_space<vmem>>, vector<1x128x128xbf16>
    %68 = vector.shape_cast %67 : vector<1x128x128xbf16> to vector<128x128xbf16>
    %cst_81 = arith.constant dense<0.000000e+00> : vector<128x128xf32>
    %69 = tpu.matmul %66, %68, %cst_81 {dimension_numbers = #tpu.dot_dimension_numbers<[1], [0], [0], [1], [0, 0, 1, 1], [], []>} : vector<128x128xbf16>, vector<128x128xbf16>, vector<128x128xf32> -> vector<128x128xf32>
    %70 = arith.addf %63, %69 : vector<128x128xf32>
    %c0_82 = arith.constant 0 : index
    %c2_83 = arith.constant 2 : index
    %c1_84 = arith.constant 1 : index
    %c0_85 = arith.constant 0 : index
    %71 = vector.load %arg9[%c0_82, %c2_83, %c1_84, %c0_85] : memref<2x10x10x128xf32, #tpu.memory_space<vmem>>, vector<2x8x8x128xf32>
    %72 = vector.shape_cast %71 : vector<2x8x8x128xf32> to vector<128x128xf32>
    %73 = arith.truncf %72 : vector<128x128xf32> to vector<128x128xbf16>
    %c7 = arith.constant 7 : index
    %c0_86 = arith.constant 0 : index
    %c0_87 = arith.constant 0 : index
    %74 = vector.load %arg5[%c7, %c0_86, %c0_87] : memref<9x128x128xbf16, #tpu.memory_space<vmem>>, vector<1x128x128xbf16>
    %75 = vector.shape_cast %74 : vector<1x128x128xbf16> to vector<128x128xbf16>
    %cst_88 = arith.constant dense<0.000000e+00> : vector<128x128xf32>
    %76 = tpu.matmul %73, %75, %cst_88 {dimension_numbers = #tpu.dot_dimension_numbers<[1], [0], [0], [1], [0, 0, 1, 1], [], []>} : vector<128x128xbf16>, vector<128x128xbf16>, vector<128x128xf32> -> vector<128x128xf32>
    %77 = arith.addf %70, %76 : vector<128x128xf32>
    %c0_89 = arith.constant 0 : index
    %c2_90 = arith.constant 2 : index
    %c2_91 = arith.constant 2 : index
    %c0_92 = arith.constant 0 : index
    %78 = vector.load %arg9[%c0_89, %c2_90, %c2_91, %c0_92] : memref<2x10x10x128xf32, #tpu.memory_space<vmem>>, vector<2x8x8x128xf32>
    %79 = vector.shape_cast %78 : vector<2x8x8x128xf32> to vector<128x128xf32>
    %80 = arith.truncf %79 : vector<128x128xf32> to vector<128x128xbf16>
    %c8 = arith.constant 8 : index
    %c0_93 = arith.constant 0 : index
    %c0_94 = arith.constant 0 : index
    %81 = vector.load %arg5[%c8, %c0_93, %c0_94] : memref<9x128x128xbf16, #tpu.memory_space<vmem>>, vector<1x128x128xbf16>
    %82 = vector.shape_cast %81 : vector<1x128x128xbf16> to vector<128x128xbf16>
    %cst_95 = arith.constant dense<0.000000e+00> : vector<128x128xf32>
    %83 = tpu.matmul %80, %82, %cst_95 {dimension_numbers = #tpu.dot_dimension_numbers<[1], [0], [0], [1], [0, 0, 1, 1], [], []>} : vector<128x128xbf16>, vector<128x128xbf16>, vector<128x128xf32> -> vector<128x128xf32>
    %84 = arith.addf %77, %83 : vector<128x128xf32>
    %c0_96 = arith.constant 0 : index
    %c0_97 = arith.constant 0 : index
    %85 = vector.load %arg6[%c0_96, %c0_97] : memref<1x128xf32, #tpu.memory_space<vmem>>, vector<1x128xf32>
    %86 = vector.broadcast %85 : vector<1x128xf32> to vector<128x128xf32>
    %87 = arith.addf %84, %86 : vector<128x128xf32>
    %cst_98 = arith.constant 0.000000e+00 : f32
    %88 = vector.broadcast %cst_98 : f32 to vector<128x128xf32>
    %89 = arith.cmpf oge, %87, %88 : vector<128x128xf32>
    %c0_99 = arith.constant 0 : index
    %c0_100 = arith.constant 0 : index
    %90 = vector.load %arg7[%c0_99, %c0_100] : memref<1x128xf32, #tpu.memory_space<vmem>>, vector<1x128xf32>
    %91 = vector.broadcast %90 : vector<1x128xf32> to vector<128x128xf32>
    %92 = arith.mulf %87, %91 : vector<128x128xf32>
    %93 = arith.select %89, %87, %92 : vector<128x128xi1>, vector<128x128xf32>
    %94 = vector.shape_cast %93 : vector<128x128xf32> to vector<2x8x8x128xf32>
    %c0_101 = arith.constant 0 : index
    %c0_102 = arith.constant 0 : index
    %c0_103 = arith.constant 0 : index
    %c0_104 = arith.constant 0 : index
    %95 = vector.load %arg8[%c0_101, %c0_102, %c0_103, %c0_104] : memref<2x8x8x128xf32, #tpu.memory_space<vmem>>, vector<2x8x8x128xf32>
    tpu.vector_store %arg8[%c0_101, %c0_102, %c0_103, %c0_104], %94 {strides = array<i32>} : memref<2x8x8x128xf32, #tpu.memory_space<vmem>>, vector<2x8x8x128xf32>,
    return
  }
  func.func @transform_0(%arg0: i32) -> (i32, i32, i32, i32) {
    %c0_i32 = arith.constant 0 : i32
    %c0_i32_0 = arith.constant 0 : i32
    %c0_i32_1 = arith.constant 0 : i32
    %c0_i32_2 = arith.constant 0 : i32
    return %arg0, %c0_i32, %c0_i32_0, %c0_i32_1 : i32, i32, i32, i32
  }
  func.func @transform_1(%arg0: i32) -> (i32, i32, i32) {
    %c0_i32 = arith.constant 0 : i32
    %c0_i32_0 = arith.constant 0 : i32
    %c0_i32_1 = arith.constant 0 : i32
    %c0_i32_2 = arith.constant 0 : i32
    return %c0_i32, %c0_i32_0, %c0_i32_1 : i32, i32, i32
  }
  func.func @transform_2(%arg0: i32) -> (i32, i32) {
    %c0_i32 = arith.constant 0 : i32
    %c0_i32_0 = arith.constant 0 : i32
    %c0_i32_1 = arith.constant 0 : i32
    return %c0_i32, %c0_i32_0 : i32, i32
  }
  func.func @transform_3(%arg0: i32) -> (i32, i32) {
    %c0_i32 = arith.constant 0 : i32
    %c0_i32_0 = arith.constant 0 : i32
    %c0_i32_1 = arith.constant 0 : i32
    return %c0_i32, %c0_i32_0 : i32, i32
  }
  func.func @transform_4(%arg0: i32) -> (i32, i32, i32) {
    %c0_i32 = arith.constant 0 : i32
    %c0_i32_0 = arith.constant 0 : i32
    %c0_i32_1 = arith.constant 0 : i32
    %c0_i32_2 = arith.constant 0 : i32
    return %c0_i32, %c0_i32_0, %c0_i32_1 : i32, i32, i32
  }
  func.func @transform_5(%arg0: i32) -> (i32, i32) {
    %c0_i32 = arith.constant 0 : i32
    %c0_i32_0 = arith.constant 0 : i32
    %c0_i32_1 = arith.constant 0 : i32
    return %c0_i32, %c0_i32_0 : i32, i32
  }
  func.func @transform_6(%arg0: i32) -> (i32, i32) {
    %c0_i32 = arith.constant 0 : i32
    %c0_i32_0 = arith.constant 0 : i32
    %c0_i32_1 = arith.constant 0 : i32
    return %c0_i32, %c0_i32_0 : i32, i32
  }
  func.func @transform_7(%arg0: i32) -> (i32, i32, i32, i32) {
    %c0_i32 = arith.constant 0 : i32
    %c0_i32_0 = arith.constant 0 : i32
    %c0_i32_1 = arith.constant 0 : i32
    %c0_i32_2 = arith.constant 0 : i32
    return %arg0, %c0_i32, %c0_i32_0, %c0_i32_1 : i32, i32, i32, i32
  }
}

</mosaic_0001>

<bundles_post_ra>
// kernel: _fused_stack_call.1
= control target key start
LH: loop header
LB: loop body
LE: loop exit
PB: predicated region body
PF: predicated region fallthrough
CT: control target
= control target key end

     0   :  { %s4424_s0 = inlined_call_operand.hbm [shape: f32[4,8,8,128], index: 0, kind: input, shape index: {}]   ;;  %s4425_s1 = inlined_call_operand.hbm [shape: bf16[1,128,128], index: 1, kind: input, shape index: {}]   ;;  %s4426_s2 = inlined_call_operand.vmem [shape: f32[1,128], index: 2, kind: input, shape index: {}]   ;;  %s4427_s3 = inlined_call_operand.vmem [shape: f32[1,128], index: 3, kind: input, shape index: {}]   ;;  %s4428_s4 = inlined_call_operand.hbm [shape: bf16[9,128,128], index: 4, kind: input, shape index: {}]   ;;  %s4429_s5 = inlined_call_operand.vmem [shape: f32[1,128], index: 5, kind: input, shape index: {}]   ;;  %s4430_s6 = inlined_call_operand.vmem [shape: f32[1,128], index: 6, kind: input, shape index: {}]   ;;  %s4431_s7 = inlined_call_operand.hbm [shape: f32[4,8,8,128], index: 7, kind: output, shape index: {}]  }
   0x1   :  { %4436 = sst [smem:[#allocation41_spill]] %s4425_s1 }
   0x2   :  { %12 = vsyncpa [#allocation4], 0 }
   0x3   :  { %14 = vsyncpa [#allocation4 + $0x1], 0 }
   0x4   :  { %15 = vsyncpa [#allocation7], 0 }
   0x5   :  { %16 = vsyncpa [#allocation5], 0 }
   0x6   :  { %18 = vsyncpa [#allocation5 + $0x1], 0  ;;  %s3573_s24 = smov 0   ;;  %s3575_s25 = smov 0  }
   0x7   :  { %s3577_s26 = smov 0   ;;  %s3579_s27 = smov 0  }
   0x8 LB: > { %s3594_s28 = sadd.s32 4294967295, %s3520_s27   ;;  %s2630_s29 = sadd.s32 4294967294, %s3520_s27   ;;  %s3520_s27 = sphi %s3579_s27, %s4511_s27   ;;  %s3516_s26 = sphi %s3577_s26, %s4510_s26   ;;  %s3512_s25 = sphi %s3575_s25, %s4509_s25   ;;  %s3508_s24 = sphi %s3573_s24, %s4508_s24  }
   0x9   : > { %p44_p0 = scmp.ne.s32.totalorder %s3512_s25, %s3508_s24  ;;  %p4432_p1 = scmp.eq.s32.totalorder %s3594_s28, 0 }
   0xa   : > { %p200_p3 = scmp.eq.s32.totalorder %s2630_s29, 1  ;;  %p2631_p5 = scmp.ge.s32.totalorder %s3520_s27, 1 }
   0xb   : > { %p3603_p4 = por %p4432_p1, %p44_p0  ;;  %p207_p7 = scmp.lt.s32.totalorder %s3520_s27, 3 }
   0xc   : > { %p3608_p6 = por %p200_p3, %p44_p0  ;;  %s3522_s10 = smov [#allocation6]  }
   0xd   : > { %s4437_s30 = scalar_select %p3603_p4, 1, 0 }
   0xe   : > { %s4438_s8 = scalar_select %p3608_p6, 1, 0 }
   0xf   : > { %p3613_p8 = pnand %p2631_p5, %p207_p7  ;;  %s219_s11 = sshll.u32 %s3522_s10, 4  ;;  %s220_s11 = int_to_ptr.vmem [resolvable:$true] %s219_s11 }
  0x10   : > { %s3523_s13 = smov [#allocation8]   ;;  %s3383_s15 = scalar_lea.vmem %s220_s11, 1024 }
  0x11   : > { %s4439_s9 = scalar_select %p3613_p8, 1, 0 }
  0x12   : > { %p3230_p9 = pneg %p3613_p8  ;;  %s238_s14 = sshll.u32 %s3523_s13, 4  ;;  %s239_s14 = int_to_ptr.vmem [resolvable:$true] %s238_s14 }
  0x13   : > { %p3384_p13 = scmp.ne.s32.totalorder %s220_s11, %s3383_s15  ;;  %p3391_p5 = scmp.lt.s32.totalorder %s220_s11, %s220_s11 }
  0x14   : > { %p3622_p11 = pnand %p3230_p9, %p4432_p1  ;;  %p3392_p7 = scmp.lt.s32.totalorder %s3383_s15, %s3383_s15 }
  0x16   : > { %p3374_p12 = pneg %p3622_p11  ;;  %p3393_p10 = por %p3392_p7, %p3391_p5 }
  0x18   : > { %p3386_p0 = pnand %p3384_p13, %p3374_p12 }
  0x1a   : > { %p3387_p3 = pneg %p3386_p0 }
  0x1c   : > { %p3394_p9 = pnand %p3393_p10, %p3387_p3 }
  0x1e   : > { %3397 = shalt.err (!%p3394_p9)
}
  0x1f   : > { %s3524_s16 = smov 64   ;;  %s3525_s17 = smov 4  }
  0x20   : > { %s4441_s1 = sld [smem:[#allocation41_spill]]  ;;  %s3409_s20 = scalar_lea.vmem %s239_s14, 9216 }
  0x21   : > { %p3410_p1 = scmp.ne.s32.totalorder %s239_s14, %s3409_s20  ;;  %p3417_p2 = scmp.lt.s32.totalorder %s239_s14, %s239_s14 }
  0x22   : > { %p3418_p6 = scmp.lt.s32.totalorder %s3409_s20, %s3409_s20 }
  0x23   : > { %p3412_p13 = pnand %p3410_p1, %p3374_p12 }
  0x24   : > { %p3419_p5 = por %p3418_p6, %p3417_p2 }
  0x25   : > { %p3413_p0 = pneg %p3412_p13 }
  0x26   : > { %3233 = dma.hbm_to_vmem [thread:$0]  (!%p3622_p11), %s4441_s1, 1024, %s220_s11, [#allocation7], %s3524_s16, %s3524_s16, %s3525_s17  }
  0x27   : > { %p3420_p10 = pnand %p3419_p5, %p3413_p0 }
  0x29   : > { %3423 = shalt.err (!%p3420_p10)
}
  0x2a   : > { %3236 = dma.hbm_to_vmem [thread:$0]  (!%p3622_p11), %s4428_s4, 9216, %s239_s14, [#allocation7], %s3524_s16, %s3524_s16, %s3525_s17  }
  0x2b   : > { %s3645_s23 = sadd.s32 1, %s3520_s27   ;;  %s31_s29 = sadd.s32 1, %s3516_s26 }
  0x2c   : > { %s28_s10 = ssub.s32 %s3520_s27, %s3645_s23  ;;  %p38_p1 = scmp.ne.s32.totalorder %s3516_s26, %s3512_s25 }
  0x2d   : > { %p29_p2 = scmp.eq.s32.totalorder %s28_s10, 0  ;;  %p39_p6 = scmp.eq.s32.totalorder %s3520_s27, 0 }
  0x2e   : > { %p4442_p12 = scmp.eq.s32.totalorder %s3594_s28, 1  ;;  %p3247_p7 = scmp.lt.s32.totalorder %s3520_s27, 2 }
  0x2f   : > { %s3661_s12 = scalar_select %p29_p2, %s3516_s26, %s31_s29  }
  0x30   : > { %p3655_p3 = por %p4442_p12, %p38_p1  ;;  %p40_p9 = por %p39_p6, %p38_p1 }
  0x31   : > { %s258_s13 = sand.u32 1, %s3516_s26   ;;  %s2735_s14 = sshll.u32 %s3520_s27, 11 }
  0x32   : > { %s4443_s11 = scalar_select %p3655_p3, 1, 0 }
  0x33   : > { %s2635_s15 = sshll.u32 %s258_s13, 7  ;;  %s3668_s18 = scalar_lea.hbm %s4424_s0, %s2735_s14 }
  0x34   : > { %s262_s19 = scalar_lea.vmem [#allocation3], %s2635_s15  ;;  %p3672_p11 = pnand %p3247_p7, %p40_p9 }
  0x35   : > { %s270_s20 = sshll.u32 %s262_s19, 4  ;;  %s3676_s22 = scalar_lea.sflag [#allocation4], %s258_s13  ;;  %s3670_s20 = int_to_ptr.vmem [resolvable:$true] %s270_s20 }
  0x36   : > { %s3424_s29 = scalar_lea.hbm %s3668_s18, 2048  ;;  %p3426_p0 = pneg %p3672_p11 }
  0x37   : > { %p3425_p13 = scmp.ne.s32.totalorder %s3668_s18, %s3424_s29  ;;  %s3429_s15 = scalar_lea.hbm %s4424_s0, 4096 }
  0x38   : > { %p3430_p1 = scmp.lt.s32.totalorder %s3668_s18, %s4424_s0  ;;  %p3431_p2 = scmp.lt.s32.totalorder %s3429_s15, %s3424_s29 }
  0x39   : > { %p3427_p5 = pnand %p3426_p0, %p3425_p13 }
  0x3a   : > { %p3432_p6 = por %p3431_p2, %p3430_p1 }
  0x3b   : > { %p3428_p10 = pneg %p3427_p5 }
  0x3d   : > { %p3433_p12 = pnand %p3432_p6, %p3428_p10 }
  0x3f   : > { %3436 = shalt.err (!%p3433_p12)
}
  0x40   : > { %s3437_s13 = scalar_lea.vmem %s3670_s20, 2048  ;;  %s3526_s19 = smov [#allocation3]  }
  0x41   : > { %p3438_p7 = scmp.ne.s32.totalorder %s3670_s20, %s3437_s13  ;;  %s3442_s1 = sshll.u32 %s3526_s19, 4  ;;  %s3443_s1 = int_to_ptr.vmem [resolvable:$false] %s3442_s1 }
  0x42   : > { %s3444_s10 = scalar_lea.vmem %s3443_s1, 4096  ;;  %p3445_p5 = scmp.lt.s32.totalorder %s3670_s20, %s3443_s1 }
  0x43   : > { %p3440_p9 = pnand %p3438_p7, %p3426_p0  ;;  %p3446_p3 = scmp.lt.s32.totalorder %s3444_s10, %s3437_s13 }
  0x45   : > { %p3441_p13 = pneg %p3440_p9  ;;  %p3447_p4 = por %p3446_p3, %p3445_p5 }
  0x47   : > { %p3448_p8 = pnand %p3447_p4, %p3441_p13 }
  0x49   : > { %3451 = shalt.err (!%p3448_p8)
}
  0x4a   : > { %s3527_s29 = smov 128   ;;  %s3528_s14 = smov 8  }
  0x4b   : > { %3240 = dma.hbm_to_vmem [thread:$0]  (!%p3672_p11), %s3668_s18, 2048, %s3670_s20, %s3676_s22, %s3527_s29, %s3527_s29, %s3528_s14  }
  0x4c   : > { %p4445_p0 = scmp.ne.s32.totalorder %s4439_s9, 0 }
  0x4e   : > { %282 = sbr.rel (%p4445_p0) target bundleno = 703 (0x2bf), region = 48 }
  0x53   : > { %s3700_s15 = sand.u32 1, %s3512_s25   ;;  %p4446_p4 = scmp.ne.s32.totalorder %s4437_s30, 0 }
  0x54   : > { %s2640_s1 = sshll.u32 %s3700_s15, 7  ;;  %s285_s16 = scalar_lea.sflag [#allocation4], %s3700_s15 }
  0x55   : > { %s3706_s17 = scalar_lea.vmem [#allocation3], %s2640_s1 }
  0x56   : > { %3495 = dma.done.wait (%p4446_p4), %s285_s16, 2048  }
  0x57   : > { %3497 = vsyncadd (%p4446_p4), %s285_s16, 4294965248  ;;  %p4447_p8 = scmp.eq.s32.totalorder %s3594_s28, 0 }
  0x59   : > { %3499 = dma.done.wait (%p4447_p8), [#allocation7], 10240   ;;  %p4448_p3 = pmov %p4447_p8 }
  0x5a   : > { %v3292_v0 = vld [vmem:[#allocation6 + $0x38] sm:$0xff]   ;;  %v3293_v1 = vld [vmem:[#allocation6 + $0x30] sm:$0xff]   ;;  %v3294_v2 = vld [vmem:[#allocation6 + $0x28] sm:$0xff]   ;;  %v3529_v42 = vmov 0.0   ;;  %s4303_s10 = scalar_lea.vmem [#allocation9], %s2640_s1  ;;  %s2737_s29 = sshll.u32 %s3594_s28, 11 }
  0x5b   : > { %3501 = vsyncadd (%p4448_p3), [#allocation7], 4294957056  ;;  %2898 = vmatprep.subr.bf16.mxu0 %v3292_v0  ;;  %v3295_v3 = vld [vmem:[#allocation6 + $0x20] sm:$0xff]   ;;  %v380_v5 = vld [vmem:[%s3706_s17 + $0x8] sm:$0xff]  ;;  %330 = vst [vmem:[#allocation2] sm:$0xff] %v3529_v42  ;;  %s2538_s14 = sshll.u32 %s4303_s10, 4  ;;  %s4379_s14 = int_to_ptr.vmem [resolvable:$true] %s2538_s14 }
  0x5c   : > { %2899 = vmatpush3.bf16.msra.mxu0 %v3292_v0  ;;  %v379_v4 = vld [vmem:[%s3706_s17] sm:$0xff]  ;;  %v3296_v7 = vld [vmem:[#allocation6 + $0x18] sm:$0xff]   ;;  %v3297_v9 = vld [vmem:[#allocation6 + $0x10] sm:$0xff]   ;;  %331 = vst [vmem:[#allocation2 + $0x8] sm:$0x3] %v3529_v42  ;;  %s2524_s28 = scalar_lea.sflag [#allocation5], %s3700_s15 }
  0x5d   : > { %2900 = vmatprep.subr.bf16.mxu0 %v3293_v1  ;;  %v395_v6 = vpack.c.bf16 %v380_v5, %v379_v4  ;;  %v3300_v8 = vld [vmem:[#allocation8 + $0x78] sm:$0xff]   ;;  %v3302_v10 = vld [vmem:[#allocation8 + $0x70] sm:$0xff]   ;;  %v3304_v11 = vld [vmem:[#allocation8 + $0x68] sm:$0xff]   ;;  %332 = vst [vmem:[#allocation2 + $0xa0] sm:$0xff] %v3529_v42  ;;  %s3452_s30 = scalar_lea.vmem %s4379_s14, 2048  ;;  %p4505_p10 = scmp.ne.s32.totalorder %s4443_s11, 0 }
  0x5e   : > { %2930 = vmatprep.subr.bf16.mxu1 %v3300_v8  ;;  %v3298_v12 = vld [vmem:[#allocation6 + $0x8] sm:$0xff]   ;;  %v3299_v13 = vld [vmem:[#allocation6] sm:$0xff]   ;;  %v381_v14 = vld [vmem:[%s3706_s17 + $0x10] sm:$0xff]  ;;  %333 = vst [vmem:[#allocation2 + $0xa8] sm:$0x3] %v3529_v42  ;;  %p3453_p11 = scmp.ne.s32.totalorder %s4379_s14, %s3452_s30  ;;  %s3530_s9 = smov [#allocation9]  }
  0x5f   : > { %2914 = vmatprep.mubr.bf16.mxu0 %v395_v6  ;;  %2931 = vmatpush3.bf16.msra.mxu1 %v3300_v8  ;;  %v382_v15 = vld [vmem:[%s3706_s17 + $0x18] sm:$0xff]  ;;  %v383_v16 = vld [vmem:[%s3706_s17 + $0x20] sm:$0xff]  ;;  %v384_v17 = vld [vmem:[%s3706_s17 + $0x28] sm:$0xff]  ;;  %335 = vst [vmem:[#allocation2 + $0x90] sm:$0xff] %v3529_v42  ;;  %s3456_s18 = sshll.u32 %s3530_s9, 4  ;;  %s3457_s18 = int_to_ptr.vmem [resolvable:$false] %s3456_s18 }
  0x60   : > { %2901 = vmatpush3.bf16.msra.mxu0 %v3293_v1  ;;  %2932 = vmatprep.subr.bf16.mxu1 %v3302_v10  ;;  %v3301_v18 = vld [vmem:[#allocation8 + $0x38] sm:$0xff]   ;;  %v396_v19 = vpack.c.bf16 %v382_v15, %v381_v14  ;;  %v3303_v20 = vld [vmem:[#allocation8 + $0x30] sm:$0xff]   ;;  %v397_v21 = vpack.c.bf16 %v384_v17, %v383_v16  ;;  %v387_v24 = vld [vmem:[%s3706_s17 + $0x40] sm:$0xff]  ;;  %336 = vst [vmem:[#allocation2 + $0x98] sm:$0x3] %v3529_v42  ;;  %p3454_p1 = pnand %p3453_p11, %p4505_p10  ;;  %s3458_s20 = scalar_lea.vmem %s3457_s18, 4096 }
  0x61   : > { %2902 = vmatprep.subr.bf16.mxu0 %v3294_v2  ;;  %v385_v22 = vld [vmem:[%s3706_s17 + $0x30] sm:$0xff]  ;;  %v386_v23 = vld [vmem:[%s3706_s17 + $0x38] sm:$0xff]  ;;  %v388_v25 = vld [vmem:[%s3706_s17 + $0x48] sm:$0xff]  ;;  %337 = vst [vmem:[#allocation2 + $0x130] sm:$0xff] %v3529_v42  ;;  %p3459_p6 = scmp.lt.s32.totalorder %s4379_s14, %s3457_s18  ;;  %p3460_p12 = scmp.lt.s32.totalorder %s3458_s20, %s3452_s30 }
  0x62   : > { %v3305_v26 = vld [vmem:[#allocation8 + $0x28] sm:$0xff]   ;;  %v398_v27 = vpack.c.bf16 %v386_v23, %v385_v22  ;;  %v399_v28 = vpack.c.bf16 %v388_v25, %v387_v24  ;;  %v389_v29 = vld [vmem:[%s3706_s17 + $0x50] sm:$0xff]  ;;  %v390_v30 = vld [vmem:[%s3706_s17 + $0x58] sm:$0xff]  ;;  %338 = vst [vmem:[#allocation2 + $0x138] sm:$0x3] %v3529_v42  ;;  %p3455_p2 = pneg %p3454_p1 }
  0x63   : > { %2933 = vmatpush3.bf16.msra.mxu1 %v3302_v10  ;;  %v391_v31 = vld [vmem:[%s3706_s17 + $0x60] sm:$0xff]  ;;  %v392_v32 = vld [vmem:[%s3706_s17 + $0x68] sm:$0xff]  ;;  %v400_v33 = vpack.c.bf16 %v390_v30, %v389_v29  ;;  %v393_v35 = vld [vmem:[%s3706_s17 + $0x70] sm:$0xff]  ;;  %340 = vst [vmem:[#allocation2 + $0x10] sm:$0x1] %v3529_v42  ;;  %p3461_p7 = por %p3460_p12, %p3459_p6 }
  0x64   : > { %2903 = vmatpush3.bf16.msra.mxu0 %v3294_v2  ;;  %2934 = vmatprep.subr.bf16.mxu1 %v3304_v11  ;;  %v401_v34 = vpack.c.bf16 %v392_v32, %v391_v31  ;;  %v394_v36 = vld [vmem:[%s3706_s17 + $0x78] sm:$0xff]  ;;  %v3306_v38 = vld [vmem:[#allocation8 + $0x60] sm:$0xff]   ;;  %v3310_v41 = vld [vmem:[#allocation8 + $0x50] sm:$0xff]   ;;  %341 = vst [vmem:[#allocation2 + $0x20] sm:$0x1] %v3529_v42  ;;  %s4377_s17 = scalar_lea.hbm %s4431_s7, %s2737_s29 }
  0x65   : > { %2904 = vmatprep.subr.bf16.mxu0 %v3295_v3  ;;  %v402_v37 = vpack.c.bf16 %v394_v36, %v393_v35  ;;  %v3308_v39 = vld [vmem:[#allocation8 + $0x58] sm:$0xff]   ;;  %v3307_v40 = vld [vmem:[#allocation8 + $0x20] sm:$0xff]   ;;  %342 = vst [vmem:[#allocation2 + $0x30] sm:$0x1] %v3529_v42  ;;  %343 = vst [vmem:[#allocation2 + $0x40] sm:$0x1] %v3529_v42  ;;  %p3462_p9 = pnand %p3461_p7, %p3455_p2 }
  0x66   : > { %344 = vst [vmem:[#allocation2 + $0x50] sm:$0x1] %v3529_v42  ;;  %345 = vst [vmem:[#allocation2 + $0x60] sm:$0x1] %v3529_v42  ;;  %v3309_v43 = vld [vmem:[#allocation8 + $0x18] sm:$0xff]   ;;  %v3312_v44 = vld [vmem:[#allocation8 + $0x48] sm:$0xff]  }
  0x67   : > { %2935 = vmatpush3.bf16.msra.mxu1 %v3304_v11  ;;  %346 = vst [vmem:[#allocation2 + $0x70] sm:$0x1] %v3529_v42  ;;  %347 = vst [vmem:[#allocation2 + $0x80] sm:$0x1] %v3529_v42  ;;  %v3311_v45 = vld [vmem:[#allocation8 + $0x10] sm:$0xff]   ;;  %v3314_v46 = vld [vmem:[#allocation8 + $0x40] sm:$0xff]  }
  0x68   : > { %2905 = vmatpush3.bf16.msra.mxu0 %v3295_v3  ;;  %2936 = vmatprep.subr.bf16.mxu1 %v3306_v38  ;;  %350 = vst [vmem:[#allocation2 + $0xb0] sm:$0x1] %v3529_v42  ;;  %351 = vst [vmem:[#allocation2 + $0xc0] sm:$0x1] %v3529_v42  ;;  %v3313_v47 = vld [vmem:[#allocation8 + $0x8] sm:$0xff]   ;;  %v3316_v48 = vld [vmem:[#allocation8 + $0xb8] sm:$0xff]  }
  0x69   : > { %2906 = vmatprep.subr.bf16.mxu0 %v3296_v7  ;;  %352 = vst [vmem:[#allocation2 + $0xd0] sm:$0x1] %v3529_v42  ;;  %353 = vst [vmem:[#allocation2 + $0xe0] sm:$0x1] %v3529_v42  ;;  %v3315_v49 = vld [vmem:[#allocation8] sm:$0xff]   ;;  %v3732_v50 = vld [vmem:[#allocation8 + $0xf8] sm:$0xff]  }
  0x6a   : > { %354 = vst [vmem:[#allocation2 + $0xf0] sm:$0x1] %v3529_v42  ;;  %355 = vst [vmem:[#allocation2 + $0x100] sm:$0x1] %v3529_v42  ;;  %v3738_v51 = vld [vmem:[%s4426_s2] ss:$0 sm:$0xff] }
  0x6b   : > { %2937 = vmatpush3.bf16.msra.mxu1 %v3306_v38  ;;  %356 = vst [vmem:[#allocation2 + $0x110] sm:$0x1] %v3529_v42  ;;  %357 = vst [vmem:[#allocation2 + $0x120] sm:$0x1] %v3529_v42  ;;  %v3743_v53 = vld [vmem:[%s4427_s3] ss:$0 sm:$0xff] }
  0x6c   : > { %2907 = vmatpush3.bf16.msra.mxu0 %v3296_v7  ;;  %2938 = vmatprep.subr.bf16.mxu1 %v3308_v39  ;;  %360 = vst [vmem:[#allocation2 + $0x19] sm:$0x1] %v3529_v42  ;;  %361 = vst [vmem:[#allocation2 + $0x29] sm:$0x1] %v3529_v42  ;;  %v683_v62 = vld [vmem:[#allocation2 + $0x1] sm:$0xff]  ;;  %v3318_v15 = vld [vmem:[#allocation8 + $0xb0] sm:$0xff]  }
  0x6d   : > { %2908 = vmatprep.subr.bf16.mxu0 %v3297_v9  ;;  %362 = vst [vmem:[#allocation2 + $0x39] sm:$0x1] %v3529_v42  ;;  %363 = vst [vmem:[#allocation2 + $0x49] sm:$0x1] %v3529_v42 }
  0x6e   : > { %364 = vst [vmem:[#allocation2 + $0x59] sm:$0x1] %v3529_v42  ;;  %365 = vst [vmem:[#allocation2 + $0x69] sm:$0x1] %v3529_v42 }
  0x6f   : > { %2939 = vmatpush3.bf16.msra.mxu1 %v3308_v39  ;;  %366 = vst [vmem:[#allocation2 + $0x79] sm:$0x1] %v3529_v42  ;;  %367 = vst [vmem:[#allocation2 + $0x89] sm:$0x1] %v3529_v42 }
  0x70   : > { %2909 = vmatpush3.bf16.msra.mxu0 %v3297_v9  ;;  %370 = vst [vmem:[#allocation2 + $0xb9] sm:$0x1] %v3529_v42  ;;  %371 = vst [vmem:[#allocation2 + $0xc9] sm:$0x1] %v3529_v42  ;;  %2940 = vmatprep.subr.bf16.mxu1 %v3310_v41 }
  0x71   : > { %2910 = vmatprep.subr.bf16.mxu0 %v3298_v12  ;;  %372 = vst [vmem:[#allocation2 + $0xd9] sm:$0x1] %v3529_v42  ;;  %373 = vst [vmem:[#allocation2 + $0xe9] sm:$0x1] %v3529_v42 }
  0x72   : > { %374 = vst [vmem:[#allocation2 + $0xf9] sm:$0x1] %v3529_v42  ;;  %375 = vst [vmem:[#allocation2 + $0x109] sm:$0x1] %v3529_v42 }
  0x73   : > { %376 = vst [vmem:[#allocation2 + $0x119] sm:$0x1] %v3529_v42  ;;  %377 = vst [vmem:[#allocation2 + $0x129] sm:$0x1] %v3529_v42  ;;  %2941 = vmatpush3.bf16.msra.mxu1 %v3310_v41  ;;  %v3319_v41 = vld [vmem:[#allocation8 + $0xf0] sm:$0xff]  }
  0x74   : > { %2911 = vmatpush3.bf16.msra.mxu0 %v3298_v12  ;;  %359 = vst [vmem:[#allocation2 + $0x9] sm:$0x1] %v3529_v42  ;;  %339 = vst [vmem:[#allocation2] sm:$0x1] %v3529_v42  ;;  %2942 = vmatprep.subr.bf16.mxu1 %v3312_v44 }
  0x75   : > { %2912 = vmatprep.subr.bf16.mxu0 %v3299_v13  ;;  %348 = vst [vmem:[#allocation2 + $0x90] sm:$0x1] %v3529_v42  ;;  %349 = vst [vmem:[#allocation2 + $0xa0] sm:$0x1] %v3529_v42 }
  0x76   : > { %358 = vst [vmem:[#allocation2 + $0x130] sm:$0x1] %v3529_v42  ;;  %368 = vst [vmem:[#allocation2 + $0x99] sm:$0x1] %v3529_v42 }
  0x77   : > { %369 = vst [vmem:[#allocation2 + $0xa9] sm:$0x1] %v3529_v42  ;;  %378 = vst [vmem:[#allocation2 + $0x139] sm:$0x1] %v3529_v42  ;;  %2943 = vmatpush3.bf16.msra.mxu1 %v3312_v44 }
  0x78   : > { %2913 = vmatpush3.bf16.msra.mxu0 %v3299_v13  ;;  %2944 = vmatprep.subr.bf16.mxu1 %v3314_v46 }
  0x79   : > { %2962 = vmatprep.subr.bf16.mxu0 %v3301_v18 }
  0x7b   : > { %2915 = vmatmul.mubr.bf16.vlgmr.msra.gmra.mxu0 %v396_v19  ;;  %2945 = vmatpush3.bf16.msra.mxu1 %v3314_v46  ;;  %v643_v19 = vld [vmem:[#allocation2] sm:$0xff] }
  0x7c   : > { %2918 = vmatprep.mubr.bf16.mxu0 %v397_v21  ;;  %2963 = vmatpush3.bf16.msra.mxu0 %v3301_v18 }
  0x7d   : > { %2964 = vmatprep.subr.bf16.mxu0 %v3303_v20  ;;  %2994 = vmatprep.subr.bf16.mxu1 %v3316_v48 }
  0x80   : > { %2965 = vmatpush3.bf16.msra.mxu0 %v3303_v20 }
  0x81   : > { %2966 = vmatprep.subr.bf16.mxu0 %v3305_v26 }
  0x83   : > { %2919 = vmatmul.mubr.bf16.gmra.mxu0 %v398_v27 }
  0x84   : > { %2922 = vmatprep.mubr.bf16.mxu0 %v399_v28  ;;  %2967 = vmatpush3.bf16.msra.mxu0 %v3305_v26  ;;  %v3320_v28 = vld [vmem:[#allocation8 + $0xa8] sm:$0xff]  }
  0x85   : > { %2968 = vmatprep.subr.bf16.mxu0 %v3307_v40 }
  0x88   : > { %2969 = vmatpush3.bf16.msra.mxu0 %v3307_v40 }
  0x89   : > { %2970 = vmatprep.subr.bf16.mxu0 %v3309_v43 }
  0x8b   : > { %2923 = vmatmul.mubr.bf16.gmra.mxu0 %v400_v33 }
  0x8c   : > { %2926 = vmatprep.mubr.bf16.mxu0 %v401_v34  ;;  %2971 = vmatpush3.bf16.msra.mxu0 %v3309_v43  ;;  %v3322_v43 = vld [vmem:[#allocation8 + $0xa0] sm:$0xff]  }
  0x8d   : > { %2972 = vmatprep.subr.bf16.mxu0 %v3311_v45 }
  0x90   : > { %2973 = vmatpush3.bf16.msra.mxu0 %v3311_v45 }
  0x91   : > { %2974 = vmatprep.subr.bf16.mxu0 %v3313_v47 }
  0x93   : > { %2927 = vmatmul.mubr.bf16.gmra.mxu0 %v402_v37 }
  0x94   : > { %2975 = vmatpush3.bf16.msra.mxu0 %v3313_v47  ;;  %v691_v47 = vld [vmem:[#allocation2 + $0xa1] sm:$0xff] }
  0x95   : > { %2976 = vmatprep.subr.bf16.mxu0 %v3315_v49 }
  0x98   : > { %2977 = vmatpush3.bf16.msra.mxu0 %v3315_v49 }
  0x99   : > { %3026 = vmatprep.subr.bf16.mxu0 %v3732_v50 }
 0x13b   : > { %v2916_v52 = vpop.f32.mrf.mxu0 }
 0x13c   : > { %v517_v54 = vadd.f32 %v2916_v52, %v3738_v51 }
 0x13d   : > { %v508_v55 = vpop.f32.mrf.mxu0 }
 0x13e   : > { %vm573_vm0 = vcmp.ge.f32.partialorder %v517_v54, 0.0  ;;  %v596_v56 = vmul.f32 %v3743_v53, %v517_v54  ;;  %v509_v57 = vadd.f32 %v3738_v51, %v508_v55 }
 0x13f   : > { %v2917_v58 = vpop.f32.mrf.mxu0 }
 0x140   : > { %v3748_v59 = vsel %vm573_vm0, %v517_v54, %v596_v56  ;;  %vm571_vm1 = vcmp.ge.f32.partialorder %v509_v57, 0.0  ;;  %v594_v60 = vmul.f32 %v3743_v53, %v509_v57  ;;  %v520_v61 = vadd.f32 %v2917_v58, %v3738_v51 }
 0x141   : > { %629 = vst [vmem:[#allocation2 + $0x31] sm:$0xff] %v3748_v59  ;;  %v511_v63 = vpop.f32.mrf.mxu0 }
 0x142   : > { %v3753_v0 = vsel %vm571_vm1, %v509_v57, %v594_v60  ;;  %vm574_vm2 = vcmp.ge.f32.partialorder %v520_v61, 0.0  ;;  %v597_v1 = vmul.f32 %v3743_v53, %v520_v61  ;;  %v512_v2 = vadd.f32 %v3738_v51, %v511_v63  ;;  %v3321_v60 = vld [vmem:[#allocation8 + $0xe8] sm:$0xff]  }
 0x143   : > { %627 = vst [vmem:[#allocation2 + $0x11] sm:$0xff] %v3753_v0  ;;  %v2920_v3 = vpop.f32.mrf.mxu0  ;;  %v699_v4 = vpack.c.bf16 %v3753_v0, %v683_v62  ;;  %v3324_v62 = vld [vmem:[#allocation8 + $0x98] sm:$0xff]  }
 0x144   : > { %v3759_v5 = vsel %vm574_vm2, %v520_v61, %v597_v1  ;;  %vm572_vm3 = vcmp.ge.f32.partialorder %v512_v2, 0.0  ;;  %v595_v6 = vmul.f32 %v3743_v53, %v512_v2  ;;  %v533_v7 = vadd.f32 %v2920_v3, %v3738_v51 }
 0x145   : > { %630 = vst [vmem:[#allocation2 + $0x41] sm:$0xff] %v3759_v5  ;;  %v524_v8 = vpop.f32.mrf.mxu0  ;;  %2946 = vmatprep.mubr.bf16.mxu1 %v699_v4  ;;  %v1435_v9 = vpack.c.bf16 %v3759_v5, %v3748_v59 }
 0x146   : > { %v3766_v10 = vsel %vm572_vm3, %v512_v2, %v595_v6  ;;  %vm577_vm4 = vcmp.ge.f32.partialorder %v533_v7, 0.0  ;;  %v600_v11 = vmul.f32 %v3743_v53, %v533_v7  ;;  %v525_v12 = vadd.f32 %v3738_v51, %v524_v8 }
 0x147   : > { %628 = vst [vmem:[#allocation2 + $0x21] sm:$0xff] %v3766_v10  ;;  %v2921_v13 = vpop.f32.mrf.mxu0  ;;  %v700_v14 = vpack.c.bf16 %v3748_v59, %v3766_v10 }
 0x148   : > { %v3773_v16 = vsel %vm577_vm4, %v533_v7, %v600_v11  ;;  %vm575_vm5 = vcmp.ge.f32.partialorder %v525_v12, 0.0  ;;  %v598_v17 = vmul.f32 %v3743_v53, %v525_v12  ;;  %v536_v18 = vadd.f32 %v2921_v13, %v3738_v51  ;;  %v3801_v38 = vld [vmem:[#allocation2 + $0x30] sm:$0xff] }
 0x149   : > { %633 = vst [vmem:[#allocation2 + $0x71] sm:$0xff] %v3773_v16  ;;  %v527_v20 = vpop.f32.mrf.mxu0  ;;  %2947 = vmatmul.mubr.bf16.vlgmr.msra.gmra.mxu1 %v700_v14  ;;  %v3323_v14 = vld [vmem:[#allocation8 + $0xe0] sm:$0xff]  }
 0x14a   : > { %v3778_v21 = vsel %vm575_vm5, %v525_v12, %v598_v17  ;;  %vm578_vm6 = vcmp.ge.f32.partialorder %v536_v18, 0.0  ;;  %v601_v22 = vmul.f32 %v3743_v53, %v536_v18  ;;  %v528_v23 = vadd.f32 %v3738_v51, %v527_v20  ;;  %v3782_v24 = vld [vmem:[#allocation2 + $0x10] sm:$0xff]  ;;  %2995 = vmatpush3.bf16.msra.mxu1 %v3316_v48 }
 0x14b   : > { %631 = vst [vmem:[#allocation2 + $0x51] sm:$0xff] %v3778_v21  ;;  %v2924_v25 = vpop.f32.mrf.mxu0  ;;  %v659_v26 = vpack.c.bf16 %v3782_v24, %v643_v19  ;;  %2996 = vmatprep.subr.bf16.mxu1 %v3318_v15  ;;  %v701_v27 = vpack.c.bf16 %v3778_v21, %v3759_v5  ;;  %v3326_v17 = vld [vmem:[#allocation8 + $0x90] sm:$0xff]   ;;  %v3353_v5 = vld [vmem:[#allocation8 + $0x1e8] sm:$0xff]  }
 0x14c   : > { %v3788_v29 = vsel %vm578_vm6, %v536_v18, %v601_v22  ;;  %vm576_vm7 = vcmp.ge.f32.partialorder %v528_v23, 0.0  ;;  %v599_v30 = vmul.f32 %v3743_v53, %v528_v23  ;;  %v549_v31 = vadd.f32 %v2924_v25, %v3738_v51  ;;  %v3821_v55 = vld [vmem:[#allocation2 + $0x40] sm:$0xff] }
 0x14d   : > { %634 = vst [vmem:[#allocation2 + $0x81] sm:$0xff] %v3788_v29  ;;  %v540_v32 = vpop.f32.mrf.mxu0  ;;  %2978 = vmatprep.mubr.bf16.mxu0 %v659_v26  ;;  %2950 = vmatprep.mubr.bf16.mxu1 %v701_v27  ;;  %v1437_v33 = vpack.c.bf16 %v3788_v29, %v3773_v16  ;;  %v651_v22 = vld [vmem:[#allocation2 + $0xa0] sm:$0xff] }
 0x14e   : > { %v3795_v34 = vsel %vm576_vm7, %v528_v23, %v599_v30  ;;  %vm581_vm8 = vcmp.ge.f32.partialorder %v549_v31, 0.0  ;;  %v604_v35 = vmul.f32 %v3743_v53, %v549_v31  ;;  %v541_v36 = vadd.f32 %v3738_v51, %v540_v32  ;;  %v3799_v37 = vld [vmem:[#allocation2 + $0x20] sm:$0xff]  ;;  %2997 = vmatpush3.bf16.msra.mxu1 %v3318_v15 }
 0x14f   : > { %632 = vst [vmem:[#allocation2 + $0x61] sm:$0xff] %v3795_v34  ;;  %v2925_v39 = vpop.f32.mrf.mxu0  ;;  %v3806_v40 = vpack.c.bf16 %v3801_v38, %v3799_v37  ;;  %2998 = vmatprep.subr.bf16.mxu1 %v3320_v28  ;;  %v702_v42 = vpack.c.bf16 %v3773_v16, %v3795_v34  ;;  %v3358_v16 = vld [vmem:[#allocation8 + $0x190] sm:$0xff]  }
 0x150   : > { %v3810_v44 = vsel %vm581_vm8, %v549_v31, %v604_v35  ;;  %vm579_vm9 = vcmp.ge.f32.partialorder %v541_v36, 0.0  ;;  %v602_v45 = vmul.f32 %v3743_v53, %v541_v36  ;;  %v552_v46 = vadd.f32 %v2925_v39, %v3738_v51  ;;  %v3845_v11 = vld [vmem:[#allocation2 + $0x70] sm:$0xff]  ;;  %v3325_v31 = vld [vmem:[#allocation8 + $0xd8] sm:$0xff]   ;;  %v3328_v35 = vld [vmem:[#allocation8 + $0x88] sm:$0xff]  }
 0x151   : > { %637 = vst [vmem:[#allocation2 + $0xd1] sm:$0xff] %v3810_v44  ;;  %v543_v48 = vpop.f32.mrf.mxu0  ;;  %2979 = vmatmul.mubr.bf16.vlgmr.msra.gmra.mxu0 %v3806_v40  ;;  %2951 = vmatmul.mubr.bf16.gmra.mxu1 %v702_v42  ;;  %v1014_v39 = vld [vmem:[#allocation2 + $0x2] sm:$0xff] }
 0x152   : > { %v3816_v49 = vsel %vm579_vm9, %v541_v36, %v602_v45  ;;  %vm582_vm10 = vcmp.ge.f32.partialorder %v552_v46, 0.0  ;;  %v605_v52 = vmul.f32 %v3743_v53, %v552_v46  ;;  %v544_v54 = vadd.f32 %v3738_v51, %v543_v48  ;;  %3027 = vmatpush3.bf16.msra.mxu0 %v3732_v50  ;;  %v3823_v56 = vld [vmem:[#allocation2 + $0x50] sm:$0xff]  ;;  %2999 = vmatpush3.bf16.msra.mxu1 %v3320_v28 }
 0x153   : > { %635 = vst [vmem:[#allocation2 + $0xb1] sm:$0xff] %v3816_v49  ;;  %v2928_v57 = vpop.f32.mrf.mxu0  ;;  %v3828_v58 = vpack.c.bf16 %v3823_v56, %v3821_v55  ;;  %3028 = vmatprep.subr.bf16.mxu0 %v3319_v41  ;;  %3000 = vmatprep.subr.bf16.mxu1 %v3322_v43  ;;  %v703_v61 = vpack.c.bf16 %v3816_v49, %v691_v47  ;;  %v3327_v47 = vld [vmem:[#allocation8 + $0xd0] sm:$0xff]  }
 0x154   : > { %v3831_v63 = vsel %vm582_vm10, %v552_v46, %v605_v52  ;;  %vm580_vm11 = vcmp.ge.f32.partialorder %v544_v54, 0.0  ;;  %v603_v50 = vmul.f32 %v3743_v53, %v544_v54  ;;  %v565_v1 = vadd.f32 %v2928_v57, %v3738_v51  ;;  %v3882_v46 = vld [vmem:[#allocation2 + $0x12] sm:$0xff]  ;;  %v3330_v52 = vld [vmem:[#allocation8 + $0x80] sm:$0xff]  }
 0x155   : > { %638 = vst [vmem:[#allocation2 + $0xe1] sm:$0xff] %v3831_v63  ;;  %v556_v2 = vpop.f32.mrf.mxu0  ;;  %2982 = vmatprep.mubr.bf16.mxu0 %v3828_v58  ;;  %2954 = vmatprep.mubr.bf16.mxu1 %v703_v61  ;;  %v1439_v3 = vpack.c.bf16 %v3831_v63, %v3810_v44 }
 0x156   : > { %v3839_v4 = vsel %vm580_vm11, %v544_v54, %v603_v50  ;;  %vm585_vm12 = vcmp.ge.f32.partialorder %v565_v1, 0.0  ;;  %v608_v6 = vmul.f32 %v3743_v53, %v565_v1  ;;  %v557_v7 = vadd.f32 %v3738_v51, %v556_v2  ;;  %3029 = vmatpush3.bf16.msra.mxu0 %v3319_v41  ;;  %v3843_v8 = vld [vmem:[#allocation2 + $0x60] sm:$0xff]  ;;  %3001 = vmatpush3.bf16.msra.mxu1 %v3322_v43  ;;  %v3332_v50 = vld [vmem:[#allocation8 + $0x138] sm:$0xff]  }
 0x157   : > { %636 = vst [vmem:[#allocation2 + $0xc1] sm:$0xff] %v3839_v4  ;;  %v2929_v12 = vpop.f32.mrf.mxu0  ;;  %v3850_v13 = vpack.c.bf16 %v3845_v11, %v3843_v8  ;;  %3030 = vmatprep.subr.bf16.mxu0 %v3321_v60  ;;  %3002 = vmatprep.subr.bf16.mxu1 %v3324_v62  ;;  %v704_v15 = vpack.c.bf16 %v3810_v44, %v3839_v4  ;;  %v3361_v44 = vld [vmem:[#allocation8 + $0x1c8] sm:$0xff]  }
 0x158   : > { %v3854_v18 = vsel %vm585_vm12, %v565_v1, %v608_v6  ;;  %vm583_vm13 = vcmp.ge.f32.partialorder %v557_v7, 0.0  ;;  %v606_v19 = vmul.f32 %v3743_v53, %v557_v7  ;;  %v568_v20 = vadd.f32 %v2929_v12, %v3738_v51  ;;  %v3880_v45 = vld [vmem:[#allocation2 + $0xd0] sm:$0xff]  ;;  %v3904_v1 = vld [vmem:[#allocation2 + $0x22] sm:$0xff] }
 0x159   : > { %641 = vst [vmem:[#allocation2 + $0x111] sm:$0xff] %v3854_v18  ;;  %v559_v23 = vpop.f32.mrf.mxu0  ;;  %2983 = vmatmul.mubr.bf16.gmra.mxu0 %v3850_v13  ;;  %2955 = vmatmul.mubr.bf16.gmra.mxu1 %v704_v15  ;;  %v1030_v54 = vpack.c.bf16 %v3882_v46, %v1014_v39  ;;  %v1234_v39 = vpack.c.bf16 %v3843_v8, %v3823_v56  ;;  %v3954_v56 = vld [vmem:[#allocation2 + $0xd2] sm:$0xff] }
 0x15a   : > { %v3860_v25 = vsel %vm583_vm13, %v557_v7, %v606_v19  ;;  %vm586_vm14 = vcmp.ge.f32.partialorder %v568_v20, 0.0  ;;  %v609_v26 = vmul.f32 %v3743_v53, %v568_v20  ;;  %v560_v27 = vadd.f32 %v3738_v51, %v559_v23  ;;  %3031 = vmatpush3.bf16.msra.mxu0 %v3321_v60  ;;  %v3864_v28 = vld [vmem:[#allocation2 + $0xb0] sm:$0xff]  ;;  %3003 = vmatpush3.bf16.msra.mxu1 %v3324_v62  ;;  %v3329_v62 = vld [vmem:[#allocation8 + $0xc8] sm:$0xff]  }
 0x15b   : > { %639 = vst [vmem:[#allocation2 + $0xf1] sm:$0xff] %v3860_v25  ;;  %v663_v30 = vpack.c.bf16 %v3864_v28, %v651_v22  ;;  %3032 = vmatprep.subr.bf16.mxu0 %v3323_v14  ;;  %3004 = vmatprep.subr.bf16.mxu1 %v3326_v17  ;;  %v705_v32 = vpack.c.bf16 %v3860_v25, %v3831_v63  ;;  %v3911_v7 = vld [vmem:[#allocation2 + $0x32] sm:$0xff]  ;;  %v3927_v22 = vld [vmem:[#allocation2 + $0x42] sm:$0xff] }
 0x15c   : > { %v3870_v36 = vsel %vm586_vm14, %v568_v20, %v609_v26  ;;  %vm584_vm15 = vcmp.ge.f32.partialorder %v560_v27, 0.0  ;;  %v607_v51 = vmul.f32 %v3743_v53, %v560_v27  ;;  %v3896_v57 = vld [vmem:[#allocation2 + $0xe0] sm:$0xff]  ;;  %v3919_v15 = vpack.c.bf16 %v3911_v7, %v3904_v1  ;;  %v3334_v20 = vld [vmem:[#allocation8 + $0x130] sm:$0xff]   ;;  %v3333_v26 = vld [vmem:[#allocation8 + $0x178] sm:$0xff]  }
 0x15d   : > { %642 = vst [vmem:[#allocation2 + $0x121] sm:$0xff] %v3870_v36  ;;  %2986 = vmatprep.mubr.bf16.mxu0 %v663_v30  ;;  %2958 = vmatprep.mubr.bf16.mxu1 %v705_v32  ;;  %v1441_v41 = vpack.c.bf16 %v3870_v36, %v3854_v18  ;;  %v1232_v19 = vpack.c.bf16 %v3799_v37, %v3782_v24  ;;  %v3336_v24 = vld [vmem:[#allocation8 + $0x128] sm:$0xff]  }
 0x15e   : > { %v3876_v42 = vsel %vm584_vm15, %v560_v27, %v607_v51  ;;  %3033 = vmatpush3.bf16.msra.mxu0 %v3323_v14  ;;  %v3878_v43 = vld [vmem:[#allocation2 + $0xc0] sm:$0xff]  ;;  %3005 = vmatpush3.bf16.msra.mxu1 %v3326_v17  ;;  %v3921_v17 = vld [vmem:[#allocation2 + $0x52] sm:$0xff]  ;;  %v1233_v30 = vpack.c.bf16 %v3821_v55, %v3801_v38  ;;  %v3337_v55 = vld [vmem:[#allocation8 + $0x168] sm:$0xff]   ;;  %v1438_v59 = vpack.c.bf16 %v3839_v4, %v3816_v49 }
 0x15f   : > { %640 = vst [vmem:[#allocation2 + $0x101] sm:$0xff] %v3876_v42  ;;  %v3887_v53 = vpack.c.bf16 %v3880_v45, %v3878_v43  ;;  %3034 = vmatprep.subr.bf16.mxu0 %v3325_v31  ;;  %3006 = vmatprep.subr.bf16.mxu1 %v3328_v35  ;;  %v3891_v48 = vpack.c.bf16 %v3854_v18, %v3876_v42  ;;  %v3331_v14 = vld [vmem:[#allocation8 + $0xc0] sm:$0xff]   ;;  %v3936_v27 = vld [vmem:[#allocation2 + $0x72] sm:$0xff] }
 0x160   : > { %v3909_v6 = vld [vmem:[#allocation2 + $0x110] sm:$0xff]  ;;  %v3931_v23 = vpack.c.bf16 %v3921_v17, %v3927_v22  ;;  %v3934_v37 = vld [vmem:[#allocation2 + $0x62] sm:$0xff]  ;;  %v1440_v29 = vpack.c.bf16 %v3876_v42, %v3860_v25 }
 0x161   : > { %2987 = vmatmul.mubr.bf16.gmra.mxu0 %v3887_v53  ;;  %2959 = vmatmul.mubr.bf16.gmra.mxu1 %v3891_v48  ;;  %v3942_v32 = vpack.c.bf16 %v3936_v27, %v3934_v37  ;;  %v3944_v51 = vld [vmem:[#allocation2 + $0xb2] sm:$0xff]  ;;  %v3362_v42 = vld [vmem:[#allocation8 + $0x180] sm:$0xff]  }
 0x162   : > { %3035 = vmatpush3.bf16.msra.mxu0 %v3325_v31  ;;  %v3898_v60 = vld [vmem:[#allocation2 + $0xf0] sm:$0xff]  ;;  %3007 = vmatpush3.bf16.msra.mxu1 %v3328_v35  ;;  %v1022_v35 = vld [vmem:[#allocation2 + $0xa2] sm:$0xff] }
 0x163   : > { %v3902_v61 = vpack.c.bf16 %v3898_v60, %v3896_v57  ;;  %3036 = vmatprep.subr.bf16.mxu0 %v3327_v47  ;;  %3010 = vmatprep.mubr.bf16.mxu1 %v1030_v54  ;;  %v3335_v31 = vld [vmem:[#allocation8 + $0x170] sm:$0xff]   ;;  %v1034_v38 = vpack.c.bf16 %v3944_v51, %v1022_v35  ;;  %v3340_v54 = vld [vmem:[#allocation8 + $0x118] sm:$0xff]   ;;  %v1237_v35 = vpack.c.bf16 %v3896_v57, %v3880_v45  ;;  %v3345_v57 = vld [vmem:[#allocation8 + $0x148] sm:$0xff]  }
 0x164   : > { %3008 = vmatprep.subr.bf16.mxu1 %v3330_v52  ;;  %v1434_v45 = vpack.c.bf16 %v3766_v10, %v3753_v0  ;;  %v3350_v0 = vld [vmem:[#allocation8 + $0x1b0] sm:$0xff]   ;;  %v1436_v10 = vpack.c.bf16 %v3795_v34, %v3778_v21  ;;  %v3354_v21 = vld [vmem:[#allocation8 + $0x1a0] sm:$0xff]   ;;  %v3356_v34 = vld [vmem:[#allocation8 + $0x198] sm:$0xff]  }
 0x165   : > { %2990 = vmatprep.mubr.bf16.mxu0 %v3902_v61  ;;  %v4027_v63 = vld [vmem:[#allocation2 + $0x122] sm:$0xff]  ;;  %v3365_v18 = vld [vmem:[#allocation8 + $0x230] sm:$0xff]  }
 0x166   : > { %3037 = vmatpush3.bf16.msra.mxu0 %v3327_v47  ;;  %v3907_v2 = vld [vmem:[#allocation2 + $0x100] sm:$0xff]  ;;  %3009 = vmatpush3.bf16.msra.mxu1 %v3330_v52 }
 0x167   : > { %v3915_v12 = vpack.c.bf16 %v3909_v6, %v3907_v2  ;;  %3038 = vmatprep.subr.bf16.mxu0 %v3329_v62  ;;  %3058 = vmatprep.subr.bf16.mxu1 %v3332_v50  ;;  %v3338_v47 = vld [vmem:[#allocation8 + $0x120] sm:$0xff]  }
 0x168   : > { %v3950_v52 = vld [vmem:[#allocation2 + $0x80] sm:$0xff] }
 0x169   : > { %2991 = vmatmul.mubr.bf16.gmra.mxu0 %v3915_v12  ;;  %3011 = vmatmul.mubr.bf16.vlgmr.msra.gmra.mxu1 %v3919_v15  ;;  %v1235_v8 = vpack.c.bf16 %v3950_v52, %v3845_v11 }
 0x16a   : > { %3039 = vmatpush3.bf16.msra.mxu0 %v3329_v62  ;;  %3042 = vmatprep.mubr.bf16.mxu0 %v1232_v19  ;;  %v3952_v62 = vld [vmem:[#allocation2 + $0xc2] sm:$0xff]  ;;  %v3962_v19 = vld [vmem:[#allocation2 + $0xf2] sm:$0xff] }
 0x16b   : > { %3040 = vmatprep.subr.bf16.mxu0 %v3331_v14  ;;  %3059 = vmatpush3.bf16.msra.mxu1 %v3332_v50  ;;  %v3339_v50 = vld [vmem:[#allocation8 + $0x160] sm:$0xff]   ;;  %v1640_v49 = vpack.c.bf16 %v3952_v62, %v3944_v51 }
 0x16c   : > { %3014 = vmatprep.mubr.bf16.mxu1 %v3931_v23  ;;  %3060 = vmatprep.subr.bf16.mxu1 %v3334_v20 }
 0x16e   : > { %3041 = vmatpush3.bf16.msra.mxu0 %v3331_v14  ;;  %v3960_v14 = vpack.c.bf16 %v3954_v56, %v3952_v62  ;;  %v3364_v62 = vld [vmem:[#allocation8 + $0x238] sm:$0xff]  }
 0x16f   : > { %3090 = vmatprep.subr.bf16.mxu0 %v3333_v26  ;;  %3061 = vmatpush3.bf16.msra.mxu1 %v3334_v20  ;;  %v1236_v20 = vpack.c.bf16 %v3878_v43, %v3864_v28  ;;  %v3344_v28 = vld [vmem:[#allocation8 + $0x108] sm:$0xff]  }
 0x170   : > { %3062 = vmatprep.subr.bf16.mxu1 %v3336_v24  ;;  %v3974_v43 = vld [vmem:[#allocation2 + $0x102] sm:$0xff] }
 0x171   : > { %3043 = vmatmul.mubr.bf16.vlgmr.msra.gmra.mxu0 %v1233_v30  ;;  %3015 = vmatmul.mubr.bf16.gmra.mxu1 %v3942_v32  ;;  %v3341_v30 = vld [vmem:[#allocation8 + $0x158] sm:$0xff]   ;;  %v1642_v51 = vpack.c.bf16 %v3974_v43, %v3962_v19 }
 0x172   : > { %3046 = vmatprep.mubr.bf16.mxu0 %v1234_v39  ;;  %3091 = vmatpush3.bf16.msra.mxu0 %v3333_v26  ;;  %v3342_v26 = vld [vmem:[#allocation8 + $0x110] sm:$0xff]  }
 0x173   : > { %3092 = vmatprep.subr.bf16.mxu0 %v3335_v31  ;;  %3063 = vmatpush3.bf16.msra.mxu1 %v3336_v24  ;;  %v3967_v24 = vld [vmem:[#allocation2 + $0xe2] sm:$0xff]  ;;  %v3343_v39 = vld [vmem:[#allocation8 + $0x150] sm:$0xff]  }
 0x174   : > { %3018 = vmatprep.mubr.bf16.mxu1 %v1034_v38  ;;  %3064 = vmatprep.subr.bf16.mxu1 %v3338_v47  ;;  %v3971_v11 = vpack.c.bf16 %v3962_v19, %v3967_v24  ;;  %v1238_v38 = vpack.c.bf16 %v3907_v2, %v3898_v60  ;;  %v3347_v2 = vld [vmem:[#allocation8 + $0x140] sm:$0xff]   ;;  %v2026_v19 = vld [vmem:[#allocation2 + $0x31] sm:$0xff] }
 0x176   : > { %3093 = vmatpush3.bf16.msra.mxu0 %v3335_v31  ;;  %v3976_v31 = vld [vmem:[#allocation2 + $0x112] sm:$0xff] }
 0x177   : > { %3094 = vmatprep.subr.bf16.mxu0 %v3337_v55  ;;  %3065 = vmatpush3.bf16.msra.mxu1 %v3338_v47  ;;  %v3982_v47 = vpack.c.bf16 %v3976_v31, %v3974_v43  ;;  %v2027_v43 = vld [vmem:[#allocation2 + $0x41] sm:$0xff] }
 0x178   : > { %3066 = vmatprep.subr.bf16.mxu1 %v3340_v54 }
 0x179   : > { %3047 = vmatmul.mubr.bf16.gmra.mxu0 %v1235_v8  ;;  %3019 = vmatmul.mubr.bf16.gmra.mxu1 %v3960_v14  ;;  %v3348_v8 = vld [vmem:[#allocation8 + $0x1b8] sm:$0xff]  }
 0x17a   : > { %3050 = vmatprep.mubr.bf16.mxu0 %v1236_v20  ;;  %3095 = vmatpush3.bf16.msra.mxu0 %v3337_v55  ;;  %v3346_v55 = vld [vmem:[#allocation8 + $0x100] sm:$0xff]   ;;  %v3352_v20 = vld [vmem:[#allocation8 + $0x1a8] sm:$0xff]  }
 0x17b   : > { %3096 = vmatprep.subr.bf16.mxu0 %v3339_v50  ;;  %3067 = vmatpush3.bf16.msra.mxu1 %v3340_v54  ;;  %v3989_v54 = vld [vmem:[#allocation2 + $0x120] sm:$0xff] }
 0x17c   : > { %3022 = vmatprep.mubr.bf16.mxu1 %v3971_v11  ;;  %3068 = vmatprep.subr.bf16.mxu1 %v3342_v26  ;;  %v1239_v60 = vpack.c.bf16 %v3989_v54, %v3909_v6  ;;  %v3349_v6 = vld [vmem:[#allocation8 + $0x1f8] sm:$0xff]  }
 0x17e   : > { %3097 = vmatpush3.bf16.msra.mxu0 %v3339_v50  ;;  %v1636_v50 = vpack.c.bf16 %v3904_v1, %v3882_v46  ;;  %v1637_v46 = vpack.c.bf16 %v3927_v22, %v3911_v7  ;;  %v3351_v1 = vld [vmem:[#allocation8 + $0x1f0] sm:$0xff]   ;;  %v3360_v22 = vld [vmem:[#allocation8 + $0x188] sm:$0xff]  }
 0x17f   : > { %3098 = vmatprep.subr.bf16.mxu0 %v3341_v30  ;;  %3069 = vmatpush3.bf16.msra.mxu1 %v3342_v26  ;;  %v1638_v26 = vpack.c.bf16 %v3934_v37, %v3921_v17  ;;  %v3355_v17 = vld [vmem:[#allocation8 + $0x1e0] sm:$0xff]   ;;  %v1641_v37 = vpack.c.bf16 %v3967_v24, %v3954_v56  ;;  %v1643_v56 = vpack.c.bf16 %v4027_v63, %v3976_v31  ;;  %v1830_v31 = vld [vmem:[#allocation2 + $0x90] sm:$0xff] }
 0x180   : > { %3070 = vmatprep.subr.bf16.mxu1 %v3344_v28  ;;  %v3363_v24 = vld [vmem:[#allocation8 + $0x1c0] sm:$0xff]  }
 0x181   : > { %3051 = vmatmul.mubr.bf16.gmra.mxu0 %v1237_v35  ;;  %3023 = vmatmul.mubr.bf16.gmra.mxu1 %v3982_v47 }
 0x182   : > { %3054 = vmatprep.mubr.bf16.mxu0 %v1238_v38  ;;  %3099 = vmatpush3.bf16.msra.mxu0 %v3341_v30 }
 0x183   : > { %3100 = vmatprep.subr.bf16.mxu0 %v3343_v39  ;;  %3071 = vmatpush3.bf16.msra.mxu1 %v3344_v28  ;;  %v3366_v28 = vld [vmem:[#allocation8 + $0x228] sm:$0xff]  }
 0x184   : > { %3074 = vmatprep.mubr.bf16.mxu1 %v1434_v45  ;;  %3072 = vmatprep.subr.bf16.mxu1 %v3346_v55  ;;  %v3367_v45 = vld [vmem:[#allocation8 + $0x220] sm:$0xff]  }
 0x186   : > { %3101 = vmatpush3.bf16.msra.mxu0 %v3343_v39  ;;  %v2030_v39 = vld [vmem:[#allocation2 + $0x71] sm:$0xff] }
 0x187   : > { %3102 = vmatprep.subr.bf16.mxu0 %v3345_v57  ;;  %3073 = vmatpush3.bf16.msra.mxu1 %v3346_v55  ;;  %v1842_v55 = vpack.c.bf16 %v1830_v31, %v3950_v52  ;;  %v2035_v52 = vld [vmem:[#allocation2 + $0xe1] sm:$0xff] }
 0x188   : > { %3122 = vmatprep.subr.bf16.mxu1 %v3348_v8 }
 0x189   : > { %3055 = vmatmul.mubr.bf16.gmra.mxu0 %v1239_v60 }
 0x18a   : > { %3103 = vmatpush3.bf16.msra.mxu0 %v3345_v57  ;;  %3106 = vmatprep.mubr.bf16.mxu0 %v1636_v50  ;;  %v2032_v57 = vld [vmem:[#allocation2 + $0x91] sm:$0xff] }
 0x18b   : > { %3104 = vmatprep.subr.bf16.mxu0 %v3347_v2  ;;  %3075 = vmatmul.mubr.bf16.vlgmr.msra.gmra.mxu1 %v1435_v9  ;;  %v4009_v9 = vld [vmem:[#allocation2 + $0x82] sm:$0xff]  ;;  %v3369_v50 = vld [vmem:[#allocation8 + $0x210] sm:$0xff]  }
 0x18c   : > { %3123 = vmatpush3.bf16.msra.mxu1 %v3348_v8  ;;  %3078 = vmatprep.mubr.bf16.mxu1 %v1436_v10  ;;  %v1639_v7 = vpack.c.bf16 %v4009_v9, %v3936_v27  ;;  %v3359_v27 = vld [vmem:[#allocation8 + $0x1d0] sm:$0xff]   ;;  %v3368_v8 = vld [vmem:[#allocation8 + $0x218] sm:$0xff]   ;;  %v2046_v10 = vpack.c.bf16 %v3860_v25, %v2035_v52 }
 0x18d   : > { %3124 = vmatprep.subr.bf16.mxu1 %v3350_v0  ;;  %v2234_v25 = vld [vmem:[#allocation2 + $0x92] sm:$0xff] }
 0x18e   : > { %3105 = vmatpush3.bf16.msra.mxu0 %v3347_v2 }
 0x18f   : > { %3154 = vmatprep.subr.bf16.mxu0 %v3349_v6 }
 0x190   : > { %3125 = vmatpush3.bf16.msra.mxu1 %v3350_v0  ;;  %v3370_v0 = vld [vmem:[#allocation8 + $0x208] sm:$0xff]  }
 0x191   : > { %3107 = vmatmul.mubr.bf16.vlgmr.msra.gmra.mxu0 %v1637_v46  ;;  %3126 = vmatprep.subr.bf16.mxu1 %v3352_v20 }
 0x192   : > { %3110 = vmatprep.mubr.bf16.mxu0 %v1638_v26  ;;  %3155 = vmatpush3.bf16.msra.mxu0 %v3349_v6  ;;  %v3371_v6 = vld [vmem:[#allocation8 + $0x200] sm:$0xff]  }
 0x193   : > { %3156 = vmatprep.subr.bf16.mxu0 %v3351_v1  ;;  %3079 = vmatmul.mubr.bf16.gmra.mxu1 %v1437_v33  ;;  %v3357_v33 = vld [vmem:[#allocation8 + $0x1d8] sm:$0xff]  }
 0x194   : > { %3127 = vmatpush3.bf16.msra.mxu1 %v3352_v20  ;;  %3082 = vmatprep.mubr.bf16.mxu1 %v1438_v59  ;;  %v2040_v20 = vld [vmem:[#allocation2 + $0x131] sm:$0xff] }
 0x195   : > { %3128 = vmatprep.subr.bf16.mxu1 %v3354_v21 }
 0x196   : > { %3157 = vmatpush3.bf16.msra.mxu0 %v3351_v1 }
 0x197   : > { %3158 = vmatprep.subr.bf16.mxu0 %v3353_v5 }
 0x198   : > { %3129 = vmatpush3.bf16.msra.mxu1 %v3354_v21 }
 0x199   : > { %3111 = vmatmul.mubr.bf16.gmra.mxu0 %v1639_v7  ;;  %3130 = vmatprep.subr.bf16.mxu1 %v3356_v34 }
 0x19a   : > { %3114 = vmatprep.mubr.bf16.mxu0 %v1640_v49  ;;  %3159 = vmatpush3.bf16.msra.mxu0 %v3353_v5 }
 0x19b   : > { %3160 = vmatprep.subr.bf16.mxu0 %v3355_v17  ;;  %3083 = vmatmul.mubr.bf16.gmra.mxu1 %v1439_v3  ;;  %v2025_v3 = vld [vmem:[#allocation2 + $0x21] sm:$0xff] }
 0x19c   : > { %3131 = vmatpush3.bf16.msra.mxu1 %v3356_v34  ;;  %3086 = vmatprep.mubr.bf16.mxu1 %v1440_v29  ;;  %v2041_v30 = vpack.c.bf16 %v2026_v19, %v2025_v3 }
 0x19d   : > { %3132 = vmatprep.subr.bf16.mxu1 %v3358_v16 }
 0x19e   : > { %3161 = vmatpush3.bf16.msra.mxu0 %v3355_v17 }
 0x19f   : > { %3162 = vmatprep.subr.bf16.mxu0 %v3357_v33 }
 0x1a0   : > { %3133 = vmatpush3.bf16.msra.mxu1 %v3358_v16 }
 0x1a1   : > { %3115 = vmatmul.mubr.bf16.gmra.mxu0 %v1641_v37  ;;  %3134 = vmatprep.subr.bf16.mxu1 %v3360_v22 }
 0x1a2   : > { %3118 = vmatprep.mubr.bf16.mxu0 %v1642_v51  ;;  %3163 = vmatpush3.bf16.msra.mxu0 %v3357_v33 }
 0x1a3   : > { %3164 = vmatprep.subr.bf16.mxu0 %v3359_v27  ;;  %3087 = vmatmul.mubr.bf16.gmra.mxu1 %v1441_v41  ;;  %v2029_v41 = vld [vmem:[#allocation2 + $0x61] sm:$0xff] }
 0x1a4   : > { %3135 = vmatpush3.bf16.msra.mxu1 %v3360_v22  ;;  %3138 = vmatprep.mubr.bf16.mxu1 %v3806_v40  ;;  %v2028_v40 = vld [vmem:[#allocation2 + $0x51] sm:$0xff]  ;;  %v2043_v38 = vpack.c.bf16 %v2030_v39, %v2029_v41 }
 0x1a5   : > { %3136 = vmatprep.subr.bf16.mxu1 %v3362_v42  ;;  %v2042_v35 = vpack.c.bf16 %v2028_v40, %v2027_v43 }
 0x1a6   : > { %3165 = vmatpush3.bf16.msra.mxu0 %v3359_v27 }
 0x1a7   : > { %3166 = vmatprep.subr.bf16.mxu0 %v3361_v44 }
 0x1a8   : > { %3137 = vmatpush3.bf16.msra.mxu1 %v3362_v42 }
 0x1a9   : > { %3119 = vmatmul.mubr.bf16.gmra.mxu0 %v1643_v56  ;;  %3186 = vmatprep.subr.bf16.mxu1 %v3364_v62 }
 0x1aa   : > { %3167 = vmatpush3.bf16.msra.mxu0 %v3361_v44  ;;  %3170 = vmatprep.mubr.bf16.mxu0 %v2041_v30 }
 0x1ab   : > { %3168 = vmatprep.subr.bf16.mxu0 %v3363_v24  ;;  %3139 = vmatmul.mubr.bf16.vlgmr.msra.gmra.mxu1 %v3828_v58  ;;  %v2031_v58 = vld [vmem:[#allocation2 + $0x81] sm:$0xff] }
 0x1ac   : > { %3187 = vmatpush3.bf16.msra.mxu1 %v3364_v62  ;;  %3142 = vmatprep.mubr.bf16.mxu1 %v3850_v13  ;;  %v2034_v13 = vld [vmem:[#allocation2 + $0xd1] sm:$0xff]  ;;  %v2044_v60 = vpack.c.bf16 %v2032_v57, %v2031_v58 }
 0x1ad   : > { %3188 = vmatprep.subr.bf16.mxu1 %v3365_v18  ;;  %v2045_v2 = vpack.c.bf16 %v2034_v13, %v3839_v4 }
 0x1ae   : > { %3169 = vmatpush3.bf16.msra.mxu0 %v3363_v24 }
 0x1b0   : > { %3189 = vmatpush3.bf16.msra.mxu1 %v3365_v18 }
 0x1b1   : > { %3171 = vmatmul.mubr.bf16.vlgmr.msra.gmra.mxu0 %v2042_v35  ;;  %3190 = vmatprep.subr.bf16.mxu1 %v3366_v28 }
 0x1b2   : > { %3174 = vmatprep.mubr.bf16.mxu0 %v2043_v38 }
 0x1b3   : > { %3143 = vmatmul.mubr.bf16.gmra.mxu1 %v1842_v55 }
 0x1b4   : > { %3191 = vmatpush3.bf16.msra.mxu1 %v3366_v28  ;;  %3146 = vmatprep.mubr.bf16.mxu1 %v3887_v53  ;;  %v1838_v53 = vld [vmem:[#allocation2 + $0x130] sm:$0xff] }
 0x1b5   : > { %3192 = vmatprep.subr.bf16.mxu1 %v3367_v45  ;;  %v1846_v4 = vpack.c.bf16 %v1838_v53, %v3989_v54 }
 0x1b8   : > { %3193 = vmatpush3.bf16.msra.mxu1 %v3367_v45 }
 0x1b9   : > { %3175 = vmatmul.mubr.bf16.gmra.mxu0 %v2044_v60  ;;  %3194 = vmatprep.subr.bf16.mxu1 %v3368_v8 }
 0x1ba   : > { %3178 = vmatprep.mubr.bf16.mxu0 %v2045_v2 }
 0x1bb   : > { %3147 = vmatmul.mubr.bf16.gmra.mxu1 %v3902_v61  ;;  %v2048_v61 = vpack.c.bf16 %v2040_v20, %v3870_v36 }
 0x1bc   : > { %3195 = vmatpush3.bf16.msra.mxu1 %v3368_v8  ;;  %3150 = vmatprep.mubr.bf16.mxu1 %v3915_v12  ;;  %v2246_v12 = vpack.c.bf16 %v2234_v25, %v4009_v9 }
 0x1bd   : > { %3196 = vmatprep.subr.bf16.mxu1 %v3369_v50 }
 0x1c0   : > { %3197 = vmatpush3.bf16.msra.mxu1 %v3369_v50 }
 0x1c1   : > { %3179 = vmatmul.mubr.bf16.gmra.mxu0 %v2046_v10  ;;  %3198 = vmatprep.subr.bf16.mxu1 %v3370_v0 }
 0x1c2   : > { %3182 = vmatprep.mubr.bf16.mxu0 %v3891_v48  ;;  %v2242_v48 = vld [vmem:[#allocation2 + $0x132] sm:$0xff] }
 0x1c3   : > { %3151 = vmatmul.mubr.bf16.gmra.mxu1 %v1846_v4 }
 0x1c4   : > { %3199 = vmatpush3.bf16.msra.mxu1 %v3370_v0  ;;  %3202 = vmatprep.mubr.bf16.mxu1 %v3919_v15  ;;  %v2250_v15 = vpack.c.bf16 %v2242_v48, %v4027_v63 }
 0x1c5   : > { %3200 = vmatprep.subr.bf16.mxu1 %v3371_v6 }
 0x1c8   : > { %3201 = vmatpush3.bf16.msra.mxu1 %v3371_v6 }
 0x1c9   : > { %3183 = vmatmul.mubr.bf16.gmra.mxu0 %v2048_v61 }
 0x1cb   : > { %3203 = vmatmul.mubr.bf16.vlgmr.msra.gmra.mxu1 %v3931_v23 }
 0x1cc   : > { %3206 = vmatprep.mubr.bf16.mxu1 %v3942_v32 }
 0x1d3   : > { %3207 = vmatmul.mubr.bf16.gmra.mxu1 %v2246_v12 }
 0x1d4   : > { %3210 = vmatprep.mubr.bf16.mxu1 %v3960_v14 }
 0x1db   : > { %3211 = vmatmul.mubr.bf16.gmra.mxu1 %v3971_v11 }
 0x1dc   : > { %3214 = vmatprep.mubr.bf16.mxu1 %v3982_v47 }
 0x1e3   : > { %3215 = vmatmul.mubr.bf16.gmra.mxu1 %v2250_v15 }
 0x209   : > { %v2948_v36 = vpop.f32.mrf.mxu1 }
 0x20b   : > { %v806_v54 = vpop.f32.mrf.mxu1 }
 0x20d   : > { %v2949_v46 = vpop.f32.mrf.mxu1 }
 0x20f   : > { %v809_v23 = vpop.f32.mrf.mxu1 }
 0x211   : > { %v2980_v1 = vpop.f32.mrf.mxu0  ;;  %v2952_v32 = vpop.f32.mrf.mxu1 }
 0x212   : > { %v960_v26 = vadd.f32 %v2980_v1, %v2948_v36 }
 0x213   : > { %v951_v21 = vpop.f32.mrf.mxu0  ;;  %v822_v59 = vpop.f32.mrf.mxu1 }
 0x214   : > { %v952_v5 = vadd.f32 %v951_v21, %v806_v54 }
 0x215   : > { %v2981_v9 = vpop.f32.mrf.mxu0  ;;  %v2953_v14 = vpop.f32.mrf.mxu1 }
 0x216   : > { %v963_v34 = vadd.f32 %v2981_v9, %v2949_v46 }
 0x217   : > { %v954_v11 = vpop.f32.mrf.mxu0  ;;  %v825_v7 = vpop.f32.mrf.mxu1 }
 0x218   : > { %v955_v47 = vadd.f32 %v954_v11, %v809_v23 }
 0x219   : > { %v2984_v17 = vpop.f32.mrf.mxu0  ;;  %v2956_v49 = vpop.f32.mrf.mxu1 }
 0x21a   : > { %v976_v16 = vadd.f32 %v2984_v17, %v2952_v32 }
 0x21b   : > { %v967_v29 = vpop.f32.mrf.mxu0  ;;  %v838_v33 = vpop.f32.mrf.mxu1 }
 0x21c   : > { %v968_v22 = vadd.f32 %v967_v29, %v822_v59 }
 0x21d   : > { %v2985_v37 = vpop.f32.mrf.mxu0  ;;  %v2957_v27 = vpop.f32.mrf.mxu1 }
 0x21e   : > { %v979_v51 = vadd.f32 %v2985_v37, %v2953_v14 }
 0x21f   : > { %v970_v42 = vpop.f32.mrf.mxu0  ;;  %v841_v44 = vpop.f32.mrf.mxu1 }
 0x220   : > { %v971_v63 = vadd.f32 %v970_v42, %v825_v7 }
 0x221   : > { %v2988_v3 = vpop.f32.mrf.mxu0  ;;  %v2960_v62 = vpop.f32.mrf.mxu1 }
 0x222   : > { %v992_v56 = vadd.f32 %v2988_v3, %v2956_v49 }
 0x223   : > { %v983_v19 = vpop.f32.mrf.mxu0  ;;  %v854_v24 = vpop.f32.mrf.mxu1 }
 0x224   : > { %v984_v30 = vadd.f32 %v983_v19, %v838_v33 }
 0x225   : > { %v2989_v18 = vpop.f32.mrf.mxu0  ;;  %v2961_v40 = vpop.f32.mrf.mxu1 }
 0x226   : > { %v995_v41 = vadd.f32 %v2989_v18, %v2957_v27 }
 0x227   : > { %v986_v28 = vpop.f32.mrf.mxu0  ;;  %v857_v43 = vpop.f32.mrf.mxu1 }
 0x228   : > { %v987_v31 = vadd.f32 %v986_v28, %v841_v44 }
 0x229   : > { %v2992_v35 = vpop.f32.mrf.mxu0  ;;  %v3012_v39 = vpop.f32.mrf.mxu1 }
 0x22a   : > { %v1008_v38 = vadd.f32 %v2992_v35, %v2960_v62  ;;  %v4051_v55 = vadd.f32 %v3012_v39, %v960_v26 }
 0x22b   : > { %v999_v45 = vpop.f32.mrf.mxu0  ;;  %v1137_v58 = vpop.f32.mrf.mxu1 }
 0x22c   : > { %v1000_v57 = vadd.f32 %v999_v45, %v854_v24  ;;  %v4053_v13 = vadd.f32 %v1137_v58, %v952_v5 }
 0x22d   : > { %v2993_v8 = vpop.f32.mrf.mxu0  ;;  %v3013_v60 = vpop.f32.mrf.mxu1 }
 0x22e   : > { %v1011_v2 = vadd.f32 %v2993_v8, %v2961_v40  ;;  %v4055_v50 = vadd.f32 %v3013_v60, %v963_v34 }
 0x22f   : > { %v1002_v52 = vpop.f32.mrf.mxu0  ;;  %v1140_v0 = vpop.f32.mrf.mxu1 }
 0x230   : > { %v1003_v53 = vadd.f32 %v1002_v52, %v857_v43  ;;  %v4057_v10 = vadd.f32 %v1140_v0, %v955_v47 }
 0x231   : > { %v4059_v4 = vpop.f32.mrf.mxu0  ;;  %v3016_v6 = vpop.f32.mrf.mxu1 }
 0x232   : > { %v4061_v20 = vadd.f32 %v3016_v6, %v976_v16 }
 0x233   : > { %v4063_v61 = vpop.f32.mrf.mxu0  ;;  %v1153_v25 = vpop.f32.mrf.mxu1 }
 0x234   : > { %v4065_v12 = vadd.f32 %v1153_v25, %v968_v22 }
 0x235   : > { %v4067_v48 = vpop.f32.mrf.mxu0  ;;  %v3017_v15 = vpop.f32.mrf.mxu1 }
 0x236   : > { %v4069_v36 = vadd.f32 %v3017_v15, %v979_v51 }
 0x237   : > { %v4071_v54 = vpop.f32.mrf.mxu0  ;;  %v1156_v46 = vpop.f32.mrf.mxu1 }
 0x238   : > { %v4073_v23 = vadd.f32 %v1156_v46, %v971_v63 }
 0x239   : > { %v4075_v1 = vpop.f32.mrf.mxu0  ;;  %v3020_v32 = vpop.f32.mrf.mxu1 }
 0x23a   : > { %v4077_v26 = vadd.f32 %v3020_v32, %v992_v56 }
 0x23b   : > { %v4079_v21 = vpop.f32.mrf.mxu0  ;;  %v1169_v59 = vpop.f32.mrf.mxu1 }
 0x23c   : > { %v4081_v5 = vadd.f32 %v1169_v59, %v984_v30 }
 0x23d   : > { %v4083_v9 = vpop.f32.mrf.mxu0  ;;  %v3021_v14 = vpop.f32.mrf.mxu1 }
 0x23e   : > { %v4085_v34 = vadd.f32 %v3021_v14, %v995_v41 }
 0x23f   : > { %v4087_v11 = vpop.f32.mrf.mxu0  ;;  %v1172_v7 = vpop.f32.mrf.mxu1 }
 0x240   : > { %v4089_v47 = vadd.f32 %v1172_v7, %v987_v31 }
 0x241   : > { %v4091_v17 = vpop.f32.mrf.mxu0  ;;  %v3024_v49 = vpop.f32.mrf.mxu1 }
 0x242   : > { %v4093_v16 = vadd.f32 %v3024_v49, %v1008_v38 }
 0x243   : > { %v4095_v29 = vpop.f32.mrf.mxu0  ;;  %v1185_v33 = vpop.f32.mrf.mxu1 }
 0x244   : > { %v4097_v22 = vadd.f32 %v1185_v33, %v1000_v57 }
 0x245   : > { %v4099_v37 = vpop.f32.mrf.mxu0  ;;  %v3025_v27 = vpop.f32.mrf.mxu1 }
 0x246   : > { %v4101_v51 = vadd.f32 %v3025_v27, %v1011_v2 }
 0x247   : > { %v4103_v42 = vpop.f32.mrf.mxu0  ;;  %v1188_v44 = vpop.f32.mrf.mxu1 }
 0x248   : > { %v4105_v63 = vadd.f32 %v1188_v44, %v1003_v53 }
 0x249   : > { %v4107_v3 = vpop.f32.mrf.mxu0 }
 0x24b   : > { %v4109_v62 = vpop.f32.mrf.mxu0  ;;  %v3076_v56 = vpop.f32.mrf.mxu1 }
 0x24d   : > { %v4111_v19 = vpop.f32.mrf.mxu0  ;;  %v4113_v24 = vpop.f32.mrf.mxu1 }
 0x24f   : > { %v4115_v30 = vpop.f32.mrf.mxu0  ;;  %v4117_v18 = vpop.f32.mrf.mxu1 }
 0x251   : > { %v3108_v40 = vpop.f32.mrf.mxu0  ;;  %v4119_v41 = vpop.f32.mrf.mxu1 }
 0x253   : > { %v4121_v28 = vpop.f32.mrf.mxu0  ;;  %v4123_v43 = vpop.f32.mrf.mxu1 }
 0x255   : > { %v4125_v31 = vpop.f32.mrf.mxu0  ;;  %v4127_v35 = vpop.f32.mrf.mxu1 }
 0x257   : > { %v4129_v39 = vpop.f32.mrf.mxu0  ;;  %v4131_v38 = vpop.f32.mrf.mxu1 }
 0x259   : > { %v4133_v45 = vpop.f32.mrf.mxu0  ;;  %v4135_v58 = vpop.f32.mrf.mxu1 }
 0x25b   : > { %v4137_v57 = vpop.f32.mrf.mxu0  ;;  %v4139_v8 = vpop.f32.mrf.mxu1 }
 0x25d   : > { %v4141_v60 = vpop.f32.mrf.mxu0  ;;  %v4143_v2 = vpop.f32.mrf.mxu1 }
 0x25e   : > { %4449 = vst [vmem:[#allocation13_spill] sm:$0xff] %v4143_v2 }
 0x25f   : > { %v4145_v52 = vpop.f32.mrf.mxu0  ;;  %v4147_v0 = vpop.f32.mrf.mxu1 }
 0x260   : > { %4450 = vst [vmem:[#allocation14_spill] sm:$0xff] %v4147_v0 }
 0x261   : > { %v4149_v53 = vpop.f32.mrf.mxu0  ;;  %v4151_v6 = vpop.f32.mrf.mxu1 }
 0x262   : > { %4451 = vst [vmem:[#allocation15_spill] sm:$0xff] %v4149_v53  ;;  %4452 = vst [vmem:[#allocation16_spill] sm:$0xff] %v4151_v6 }
 0x263   : > { %v4153_v25 = vpop.f32.mrf.mxu0  ;;  %v4155_v15 = vpop.f32.mrf.mxu1 }
 0x264   : > { %4453 = vst [vmem:[#allocation17_spill] sm:$0xff] %v4153_v25  ;;  %4454 = vst [vmem:[#allocation18_spill] sm:$0xff] %v4155_v15 }
 0x265   : > { %v4157_v46 = vpop.f32.mrf.mxu0  ;;  %v4159_v32 = vpop.f32.mrf.mxu1 }
 0x266   : > { %4455 = vst [vmem:[#allocation19_spill] sm:$0xff] %v4157_v46  ;;  %4456 = vst [vmem:[#allocation20_spill] sm:$0xff] %v4159_v32 }
 0x267   : > { %v4161_v59 = vpop.f32.mrf.mxu0  ;;  %v4163_v14 = vpop.f32.mrf.mxu1 }
 0x268   : > { %4457 = vst [vmem:[#allocation21_spill] sm:$0xff] %v4161_v59  ;;  %4458 = vst [vmem:[#allocation22_spill] sm:$0xff] %v4163_v14 }
 0x269   : > { %v4165_v7 = vpop.f32.mrf.mxu0  ;;  %v4167_v49 = vpop.f32.mrf.mxu1 }
 0x26a   : > { %4459 = vst [vmem:[#allocation23_spill] sm:$0xff] %v4165_v7  ;;  %4460 = vst [vmem:[#allocation24_spill] sm:$0xff] %v4167_v49 }
 0x26b   : > { %v4169_v33 = vpop.f32.mrf.mxu0  ;;  %v3140_v27 = vpop.f32.mrf.mxu1 }
 0x26c   : > { %4461 = vst [vmem:[#allocation25_spill] sm:$0xff] %v4169_v33 }
 0x26d   : > { %v4171_v44 = vpop.f32.mrf.mxu0  ;;  %v1946_v25 = vpop.f32.mrf.mxu1 }
 0x26e   : > { %4462 = vst [vmem:[#allocation26_spill] sm:$0xff] %v4171_v44 }
 0x26f   : > { %v4173_v6 = vpop.f32.mrf.mxu0  ;;  %v4175_v15 = vpop.f32.mrf.mxu1 }
 0x270   : > { %4463 = vst [vmem:[#allocation27_spill] sm:$0xff] %v4173_v6  ;;  %4464 = vst [vmem:[#allocation28_spill] sm:$0xff] %v4175_v15 }
 0x271   : > { %v3172_v46 = vpop.f32.mrf.mxu0  ;;  %v4177_v32 = vpop.f32.mrf.mxu1 }
 0x272   : > { %4465 = vst [vmem:[#allocation29_spill] sm:$0xff] %v4177_v32 }
 0x273   : > { %v2148_v59 = vpop.f32.mrf.mxu0  ;;  %v4179_v53 = vpop.f32.mrf.mxu1 }
 0x274   : > { %4466 = vst [vmem:[#allocation30_spill] sm:$0xff] %v4179_v53 }
 0x275   : > { %v4181_v14 = vpop.f32.mrf.mxu0  ;;  %v4183_v7 = vpop.f32.mrf.mxu1 }
 0x276   : > { %4467 = vst [vmem:[#allocation31_spill] sm:$0xff] %v4181_v14  ;;  %4468 = vst [vmem:[#allocation32_spill] sm:$0xff] %v4183_v7  ;;  %v1404_v7 = vadd.f32 %v4059_v4, %v4051_v55  ;;  %v1406_v55 = vadd.f32 %v4079_v21, %v4065_v12  ;;  %v1409_v4 = vadd.f32 %v4083_v9, %v4069_v36 }
 0x277   : > { %v4185_v49 = vpop.f32.mrf.mxu0  ;;  %v4187_v33 = vpop.f32.mrf.mxu1  ;;  %v1413_v12 = vadd.f32 %v4099_v37, %v4085_v34  ;;  %v1416_v36 = vadd.f32 %v4107_v3, %v4093_v16  ;;  %v4248_v9 = vadd.f32 %v4111_v19, %v4101_v51  ;;  %v4252_v34 = vadd.f32 %v4115_v30, %v4105_v63 }
 0x278   : > { %4469 = vst [vmem:[#allocation33_spill] sm:$0xff] %v4187_v33  ;;  %v1611_v3 = vadd.f32 %v4131_v38, %v1409_v4  ;;  %v4280_v38 = vld [vmem:[%s4430_s6] ss:$0 sm:$0xff] }
 0x279   : > { %v4189_v44 = vpop.f32.mrf.mxu0  ;;  %v4191_v0 = vpop.f32.mrf.mxu1 }
 0x27a   : > { %4470 = vst [vmem:[#allocation34_spill] sm:$0xff] %v4189_v44  ;;  %4471 = vst [vmem:[#allocation35_spill] sm:$0xff] %v4191_v0  ;;  %v1402_v0 = vadd.f32 %v4063_v61, %v4053_v13  ;;  %v1407_v13 = vadd.f32 %v4087_v11, %v4073_v23  ;;  %v1414_v23 = vadd.f32 %v4109_v62, %v4097_v22 }
 0x27b   : > { %v4193_v6 = vpop.f32.mrf.mxu1  ;;  %v4195_v15 = vpop.f32.mrf.mxu0 }
 0x27c   : > { %4472 = vst [vmem:[#allocation36_spill] sm:$0xff] %v4193_v6  ;;  %4473 = vst [vmem:[#allocation37_spill] sm:$0xff] %v4195_v15  ;;  %v1405_v6 = vadd.f32 %v4067_v48, %v4055_v50  ;;  %v1606_v15 = vadd.f32 %v3076_v56, %v1404_v7  ;;  %v1412_v50 = vadd.f32 %v4091_v17, %v4077_v26  ;;  %v4267_v56 = vld [vmem:[%s4429_s5] ss:$0 sm:$0xff] }
 0x27d   : > { %v4197_v32 = vpop.f32.mrf.mxu1  ;;  %v4201_v53 = vpop.f32.mrf.mxu0  ;;  %v1411_v48 = vadd.f32 %v4103_v42, %v4089_v47  ;;  %v1609_v63 = vadd.f32 %v4135_v58, %v1407_v13  ;;  %v4479_v58 = vld [vmem:[#allocation14_spill] sm:$0xff] }
 0x27e   : > { %v1808_v61 = vadd.f32 %v3108_v40, %v1606_v15  ;;  %v1607_v26 = vadd.f32 %v4117_v18, %v1405_v6 }
 0x27f   : > { %v4199_v2 = vpop.f32.mrf.mxu1  ;;  %v4213_v44 = vpop.f32.mrf.mxu0 }
 0x280   : > { %4474 = vst [vmem:[#allocation38_spill] sm:$0xff] %v4199_v2  ;;  %v1403_v2 = vadd.f32 %v4071_v54, %v4057_v10  ;;  %v1604_v10 = vadd.f32 %v4113_v24, %v1402_v0  ;;  %v2011_v21 = vadd.f32 %v3140_v27, %v1808_v61  ;;  %v1809_v16 = vadd.f32 %v4125_v31, %v1607_v26  ;;  %v4485_v61 = vld [vmem:[#allocation17_spill] sm:$0xff] }
 0x281   : > { %v4203_v14 = vpop.f32.mrf.mxu1  ;;  %v1614_v24 = vadd.f32 %v4139_v8, %v1412_v50  ;;  %v4480_v8 = vld [vmem:[#allocation29_spill] sm:$0xff] }
 0x282   : > { %4475 = vst [vmem:[#allocation39_spill] sm:$0xff] %v4203_v14  ;;  %v1408_v14 = vadd.f32 %v4075_v1, %v4061_v20  ;;  %v1410_v20 = vadd.f32 %v4095_v29, %v4081_v5  ;;  %v1806_v1 = vadd.f32 %v4121_v28, %v1604_v10  ;;  %v4244_v5 = vpop.f32.mrf.mxu0  ;;  %v1605_v11 = vadd.f32 %v4119_v41, %v1403_v2 }
 0x283   : > { %v4207_v33 = vpop.f32.mrf.mxu1  ;;  %v1608_v29 = vadd.f32 %v4127_v35, %v1406_v55  ;;  %v2213_v22 = vadd.f32 %v3172_v46, %v2011_v21  ;;  %v1813_v41 = vadd.f32 %v4141_v60, %v1611_v3  ;;  %v1811_v28 = vadd.f32 %v4145_v52, %v1609_v63  ;;  %v4478_v35 = vld [vmem:[#allocation28_spill] sm:$0xff]  ;;  %v4481_v60 = vld [vmem:[#allocation15_spill] sm:$0xff] }
 0x284   : > { %4476 = vst [vmem:[#allocation40_spill] sm:$0xff] %v4207_v33  ;;  %v1610_v47 = vadd.f32 %v4123_v43, %v1408_v14  ;;  %v2009_v37 = vadd.f32 %v1946_v25, %v1806_v1  ;;  %v1807_v42 = vadd.f32 %v4129_v39, %v1605_v11  ;;  %v4271_v18 = vpop.f32.mrf.mxu0  ;;  %v4477_v43 = vld [vmem:[#allocation13_spill] sm:$0xff]  ;;  %v2012_v39 = vadd.f32 %v4478_v35, %v1809_v16  ;;  %v4482_v52 = vld [vmem:[#allocation16_spill] sm:$0xff]  ;;  %v4483_v46 = vld [vmem:[#allocation31_spill] sm:$0xff] }
 0x285   : > { %v4223_v33 = vpop.f32.mrf.mxu1  ;;  %v1810_v19 = vadd.f32 %v4137_v57, %v1608_v29  ;;  %v1612_v31 = vadd.f32 %v4477_v43, %v1410_v20  ;;  %v1615_v57 = vadd.f32 %v4479_v58, %v1413_v12  ;;  %v1816_v25 = vadd.f32 %v4481_v60, %v1614_v24  ;;  %v4484_v14 = vld [vmem:[#allocation30_spill] sm:$0xff]  ;;  %v4488_v16 = vld [vmem:[#allocation19_spill] sm:$0xff] }
 0x286   : > { %v1812_v51 = vadd.f32 %v4133_v45, %v1610_v47  ;;  %v2211_v30 = vadd.f32 %v2148_v59, %v2009_v37  ;;  %v2010_v2 = vadd.f32 %v4480_v8, %v1807_v42  ;;  %v1613_v15 = vadd.f32 %v4482_v52, %v1411_v48  ;;  %v4290_v4 = vpop.f32.mrf.mxu0  ;;  %v4486_v20 = vld [vmem:[#allocation34_spill] sm:$0xff]  ;;  %v4487_v48 = vld [vmem:[#allocation32_spill] sm:$0xff]  ;;  %v4493_v35 = vld [vmem:[#allocation35_spill] sm:$0xff] }
 0x287   : > { %v4238_v54 = vpop.f32.mrf.mxu1  ;;  %v2214_v59 = vadd.f32 %v4483_v46, %v2012_v39  ;;  %v1814_v10 = vadd.f32 %v4485_v61, %v1612_v31  ;;  %v2013_v1 = vadd.f32 %v4487_v48, %v1810_v19  ;;  %v1817_v29 = vadd.f32 %v4488_v16, %v1615_v57  ;;  %v4490_v42 = vld [vmem:[#allocation20_spill] sm:$0xff]  ;;  %v4492_v31 = vld [vmem:[#allocation33_spill] sm:$0xff]  ;;  %v4499_v16 = vld [vmem:[#allocation38_spill] sm:$0xff] }
 0x288   : > { %v2015_v7 = vadd.f32 %v4484_v14, %v1812_v51  ;;  %v2212_v55 = vadd.f32 %v4185_v49, %v2010_v2  ;;  %v1616_v51 = vadd.f32 %v4490_v42, %v1414_v23  ;;  %v2183_v24 = vpop.f32.mrf.mxu0  ;;  %v2014_v23 = vadd.f32 %v4493_v35, %v1811_v28  ;;  %v4497_v48 = vld [vmem:[#allocation25_spill] sm:$0xff] }
 0x289   : > { %v4256_v17 = vpop.f32.mrf.mxu1  ;;  %v4500_v42 = vld [vmem:[#allocation39_spill] sm:$0xff] }
 0x28a   : > { %v2217_v12 = vadd.f32 %v4486_v20, %v2015_v7  ;;  %v3184_v52 = vpop.f32.mrf.mxu0  ;;  %v4495_v7 = vld [vmem:[#allocation21_spill] sm:$0xff]  ;;  %v4496_v20 = vld [vmem:[#allocation23_spill] sm:$0xff] }
 0x28b   : > { %v3204_v62 = vpop.f32.mrf.mxu1 }
 0x28c   : > { %v2415_v40 = vadd.f32 %v3204_v62, %v2213_v22  ;;  %v4489_v22 = vld [vmem:[#allocation18_spill] sm:$0xff]  ;;  %v4491_v62 = vld [vmem:[#allocation37_spill] sm:$0xff] }
 0x28d   : > { %v2350_v45 = vpop.f32.mrf.mxu1  ;;  %v1618_v37 = vadd.f32 %v4489_v22, %v1416_v36  ;;  %v2215_v19 = vadd.f32 %v4491_v62, %v2013_v1  ;;  %v2016_v36 = vadd.f32 %v4492_v31, %v1813_v41  ;;  %v4494_v41 = vld [vmem:[#allocation36_spill] sm:$0xff]  ;;  %v1818_v1 = vadd.f32 %v4497_v48, %v1616_v51 }
 0x28e   : > { %v2438_v0 = vadd.f32 %v4267_v56, %v2415_v40  ;;  %v2413_v6 = vadd.f32 %v2350_v45, %v2211_v30  ;;  %v2020_v22 = vadd.f32 %v4499_v16, %v1817_v29 }
 0x28f   : > { %v3205_v27 = vpop.f32.mrf.mxu1  ;;  %v2218_v2 = vadd.f32 %v4201_v53, %v2016_v36  ;;  %v2017_v53 = vadd.f32 %v4197_v32, %v1814_v10 }
 0x290   : > { %vm2454_vm0 = vcmp.ge.f32.partialorder %v2438_v0, 0.0  ;;  %v2477_v13 = vmul.f32 %v4280_v38, %v2438_v0  ;;  %v2436_v50 = vadd.f32 %v4267_v56, %v2413_v6  ;;  %v2416_v26 = vadd.f32 %v3205_v27, %v2214_v59 }
 0x291   : > { %v2353_v21 = vpop.f32.mrf.mxu1  ;;  %v2019_v6 = vadd.f32 %v4494_v41, %v1816_v25  ;;  %v1815_v27 = vadd.f32 %v4495_v7, %v1613_v15  ;;  %v2219_v10 = vadd.f32 %v4271_v18, %v2017_v53  ;;  %v2222_v62 = vadd.f32 %v4290_v4, %v2020_v22  ;;  %v4503_v41 = vld [vmem:[#allocation26_spill] sm:$0xff] }
 0x292   : > { %v2493_v11 = vsel %vm2454_vm0, %v2438_v0, %v2477_v13  ;;  %vm2452_vm1 = vcmp.ge.f32.partialorder %v2436_v50, 0.0  ;;  %v2475_v49 = vmul.f32 %v4280_v38, %v2436_v50  ;;  %v2414_v47 = vadd.f32 %v2353_v21, %v2212_v55  ;;  %v2196_v21 = vpop.f32.mrf.mxu0 }
 0x293   : > { %2509 = vst [vmem:[%s4303_s10 + $0x10] sm:$0xff] %v2493_v11  ;;  %v2439_v3 = vadd.f32 %v4267_v56, %v2416_v26  ;;  %v3208_v63 = vpop.f32.mrf.mxu1  ;;  %v2216_v0 = vadd.f32 %v4213_v44, %v2014_v23  ;;  %v2221_v55 = vadd.f32 %v4244_v5, %v2019_v6  ;;  %v4498_v26 = vld [vmem:[#allocation22_spill] sm:$0xff]  ;;  %v2021_v4 = vadd.f32 %v4223_v33, %v1818_v1 }
 0x294   : > { %v2491_v30 = vsel %vm2452_vm1, %v2436_v50, %v2475_v49  ;;  %v2437_v40 = vadd.f32 %v4267_v56, %v2414_v47  ;;  %v2419_v43 = vadd.f32 %v3208_v63, %v2217_v12  ;;  %v1820_v12 = vadd.f32 %v4496_v20, %v1618_v37  ;;  %v3185_v31 = vpop.f32.mrf.mxu0 }
 0x295   : > { %2507 = vst [vmem:[%s4303_s10] sm:$0xff] %v2491_v30  ;;  %vm2455_vm2 = vcmp.ge.f32.partialorder %v2439_v3, 0.0  ;;  %v2478_v39 = vmul.f32 %v4280_v38, %v2439_v3  ;;  %v2366_v45 = vpop.f32.mrf.mxu1  ;;  %v1619_v15 = vadd.f32 %v4498_v26, %v4248_v9  ;;  %v2018_v37 = vadd.f32 %v4500_v42, %v1815_v27  ;;  %v4501_v30 = vld [vmem:[#allocation40_spill] sm:$0xff] }
 0x296   : > { %vm2453_vm3 = vcmp.ge.f32.partialorder %v2437_v40, 0.0  ;;  %v2476_v58 = vmul.f32 %v4280_v38, %v2437_v40  ;;  %v2442_v57 = vadd.f32 %v4267_v56, %v2419_v43  ;;  %v2417_v8 = vadd.f32 %v2366_v45, %v2215_v19 }
 0x297   : > { %v2494_v60 = vsel %vm2455_vm2, %v2439_v3, %v2478_v39  ;;  %v3209_v28 = vpop.f32.mrf.mxu1  ;;  %v2220_v19 = vadd.f32 %v2183_v24, %v2018_v37  ;;  %v2023_v29 = vadd.f32 %v4501_v30, %v1820_v12  ;;  %v4502_v39 = vld [vmem:[#allocation24_spill] sm:$0xff]  ;;  %v1821_v6 = vadd.f32 %v4503_v41, %v1619_v15 }
 0x298   : > { %2510 = vst [vmem:[%s4303_s10 + $0x18] sm:$0xff] %v2494_v60  ;;  %v2492_v46 = vsel %vm2453_vm3, %v2437_v40, %v2476_v58  ;;  %vm2458_vm4 = vcmp.ge.f32.partialorder %v2442_v57, 0.0  ;;  %v2481_v59 = vmul.f32 %v4280_v38, %v2442_v57  ;;  %v2440_v14 = vadd.f32 %v4267_v56, %v2417_v8  ;;  %v4504_v60 = vld [vmem:[#allocation27_spill] sm:$0xff] }
 0x299   : > { %2508 = vst [vmem:[%s4303_s10 + $0x8] sm:$0xff] %v2492_v46  ;;  %v2420_v44 = vadd.f32 %v3209_v28, %v2218_v2  ;;  %v2369_v25 = vpop.f32.mrf.mxu1  ;;  %v1617_v45 = vadd.f32 %v4502_v39, %v4252_v34  ;;  %v2225_v58 = vadd.f32 %v3184_v52, %v2023_v29  ;;  %v2223_v52 = vadd.f32 %v2196_v21, %v2021_v4 }
 0x29a   : > { %v2497_v13 = vsel %vm2458_vm4, %v2442_v57, %v2481_v59  ;;  %vm2456_vm5 = vcmp.ge.f32.partialorder %v2440_v14, 0.0  ;;  %v2479_v50 = vmul.f32 %v4280_v38, %v2440_v14  ;;  %v2418_v61 = vadd.f32 %v2369_v25, %v2216_v0  ;;  %v2199_v59 = vpop.f32.mrf.mxu0 }
 0x29b   : > { %2513 = vst [vmem:[%s4303_s10 + $0x30] sm:$0xff] %v2497_v13  ;;  %v2443_v5 = vadd.f32 %v4267_v56, %v2420_v44  ;;  %v3212_v32 = vpop.f32.mrf.mxu1  ;;  %v1819_v28 = vadd.f32 %v4504_v60, %v1617_v45  ;;  %v2024_v27 = vadd.f32 %v4238_v54, %v1821_v6 }
 0x29c   : > { %v2495_v11 = vsel %vm2456_vm5, %v2440_v14, %v2479_v50  ;;  %v2441_v49 = vadd.f32 %v4267_v56, %v2418_v61  ;;  %v2423_v47 = vadd.f32 %v3212_v32, %v2221_v55 }
 0x29d   : > { %2511 = vst [vmem:[%s4303_s10 + $0x20] sm:$0xff] %v2495_v11  ;;  %vm2459_vm6 = vcmp.ge.f32.partialorder %v2443_v5, 0.0  ;;  %v2482_v9 = vmul.f32 %v4280_v38, %v2443_v5  ;;  %v2382_v51 = vpop.f32.mrf.mxu1  ;;  %v2022_v55 = vadd.f32 %v4256_v17, %v1819_v28  ;;  %v2226_v61 = vadd.f32 %v3185_v31, %v2024_v27 }
 0x29e   : > { %vm2457_vm7 = vcmp.ge.f32.partialorder %v2441_v49, 0.0  ;;  %v2480_v3 = vmul.f32 %v4280_v38, %v2441_v49  ;;  %v2446_v18 = vadd.f32 %v4267_v56, %v2423_v47  ;;  %v2421_v63 = vadd.f32 %v2382_v51, %v2219_v10 }
 0x29f   : > { %v2498_v40 = vsel %vm2459_vm6, %v2443_v5, %v2482_v9  ;;  %v3213_v43 = vpop.f32.mrf.mxu1  ;;  %v2224_v20 = vadd.f32 %v2199_v59, %v2022_v55 }
 0x2a0   : > { %2514 = vst [vmem:[%s4303_s10 + $0x38] sm:$0xff] %v2498_v40  ;;  %v2496_v36 = vsel %vm2457_vm7, %v2441_v49, %v2480_v3  ;;  %vm2462_vm8 = vcmp.ge.f32.partialorder %v2446_v18, 0.0  ;;  %v2485_v35 = vmul.f32 %v4280_v38, %v2446_v18  ;;  %v2444_v23 = vadd.f32 %v4267_v56, %v2421_v63 }
 0x2a1   : > { %2512 = vst [vmem:[%s4303_s10 + $0x28] sm:$0xff] %v2496_v36  ;;  %v2424_v24 = vadd.f32 %v3213_v43, %v2222_v62  ;;  %v2385_v57 = vpop.f32.mrf.mxu1 }
 0x2a2   : > { %v2501_v8 = vsel %vm2462_vm8, %v2446_v18, %v2485_v35  ;;  %vm2460_vm9 = vcmp.ge.f32.partialorder %v2444_v23, 0.0  ;;  %v2483_v2 = vmul.f32 %v4280_v38, %v2444_v23  ;;  %v2422_v0 = vadd.f32 %v2385_v57, %v2220_v19 }
 0x2a3   : > { %2517 = vst [vmem:[%s4303_s10 + $0x50] sm:$0xff] %v2501_v8  ;;  %v2447_v46 = vadd.f32 %v4267_v56, %v2424_v24  ;;  %v3216_v34 = vpop.f32.mrf.mxu1 }
 0x2a4   : > { %v2499_v33 = vsel %vm2460_vm9, %v2444_v23, %v2483_v2  ;;  %v2445_v14 = vadd.f32 %v4267_v56, %v2422_v0  ;;  %v2427_v7 = vadd.f32 %v3216_v34, %v2225_v58 }
 0x2a5   : > { %2515 = vst [vmem:[%s4303_s10 + $0x40] sm:$0xff] %v2499_v33  ;;  %vm2463_vm10 = vcmp.ge.f32.partialorder %v2447_v46, 0.0  ;;  %v2486_v53 = vmul.f32 %v4280_v38, %v2447_v46  ;;  %v2398_v44 = vpop.f32.mrf.mxu1 }
 0x2a6   : > { %vm2461_vm11 = vcmp.ge.f32.partialorder %v2445_v14, 0.0  ;;  %v2484_v25 = vmul.f32 %v4280_v38, %v2445_v14  ;;  %v2450_v13 = vadd.f32 %v4267_v56, %v2427_v7  ;;  %v2425_v50 = vadd.f32 %v2398_v44, %v2223_v52 }
 0x2a7   : > { %v2502_v12 = vsel %vm2463_vm10, %v2447_v46, %v2486_v53  ;;  %v3217_v54 = vpop.f32.mrf.mxu1 }
 0x2a8   : > { %2518 = vst [vmem:[%s4303_s10 + $0x58] sm:$0xff] %v2502_v12  ;;  %v2500_v17 = vsel %vm2461_vm11, %v2445_v14, %v2484_v25  ;;  %vm2466_vm12 = vcmp.ge.f32.partialorder %v2450_v13, 0.0  ;;  %v2489_v48 = vmul.f32 %v4280_v38, %v2450_v13  ;;  %v2448_v1 = vadd.f32 %v4267_v56, %v2425_v50 }
 0x2a9   : > { %2516 = vst [vmem:[%s4303_s10 + $0x48] sm:$0xff] %v2500_v17  ;;  %v2428_v26 = vadd.f32 %v3217_v54, %v2226_v61  ;;  %v2401_v15 = vpop.f32.mrf.mxu1 }
 0x2aa   : > { %v2505_v5 = vsel %vm2466_vm12, %v2450_v13, %v2489_v48  ;;  %vm2464_vm13 = vcmp.ge.f32.partialorder %v2448_v1, 0.0  ;;  %v2487_v32 = vmul.f32 %v4280_v38, %v2448_v1  ;;  %v2426_v10 = vadd.f32 %v2401_v15, %v2224_v20 }
 0x2ab   : > { %2521 = vst [vmem:[%s4303_s10 + $0x70] sm:$0xff] %v2505_v5  ;;  %v2451_v21 = vadd.f32 %v4267_v56, %v2428_v26 }
 0x2ac   : > { %v2503_v11 = vsel %vm2464_vm13, %v2448_v1, %v2487_v32  ;;  %v2449_v49 = vadd.f32 %v4267_v56, %v2426_v10 }
 0x2ad   : > { %2519 = vst [vmem:[%s4303_s10 + $0x60] sm:$0xff] %v2503_v11  ;;  %vm2467_vm14 = vcmp.ge.f32.partialorder %v2451_v21, 0.0  ;;  %v2490_v47 = vmul.f32 %v4280_v38, %v2451_v21 }
 0x2ae   : > { %vm2465_vm15 = vcmp.ge.f32.partialorder %v2449_v49, 0.0  ;;  %v2488_v16 = vmul.f32 %v4280_v38, %v2449_v49 }
 0x2af   : > { %v2506_v22 = vsel %vm2467_vm14, %v2451_v21, %v2490_v47 }
 0x2b0   : > { %2522 = vst [vmem:[%s4303_s10 + $0x78] sm:$0xff] %v2506_v22  ;;  %v2504_v56 = vsel %vm2465_vm15, %v2449_v49, %v2488_v16 }
 0x2b1   : > { %2520 = vst [vmem:[%s4303_s10 + $0x68] sm:$0xff] %v2504_v56 }
 0x2b2   : > { %3465 = shalt.err (!%p3462_p9)
}
 0x2b3   : > { %s3466_s21 = scalar_lea.hbm %s4377_s17, 2048  ;;  %s3470_s19 = scalar_lea.hbm %s4431_s7, 4096 }
 0x2b4   : > { %p3467_p13 = scmp.ne.s32.totalorder %s4377_s17, %s3466_s21  ;;  %p3471_p4 = scmp.lt.s32.totalorder %s4377_s17, %s4431_s7 }
 0x2b5   : > { %p3472_p8 = scmp.lt.s32.totalorder %s3470_s19, %s3466_s21 }
 0x2b6   : > { %p3468_p5 = pnand %p3467_p13, %p4505_p10 }
 0x2b7   : > { %p3473_p3 = por %p3472_p8, %p3471_p4 }
 0x2b8   : > { %p3469_p0 = pneg %p3468_p5 }
 0x2ba   : > { %p3474_p11 = pnand %p3473_p3, %p3469_p0 }
 0x2bc   : > { %3477 = shalt.err (!%p3474_p11)
}
 0x2bd   : > { %s3531_s1 = smov 128   ;;  %s3532_s16 = smov 8  }
 0x2be   : > { %3228 = dma.vmem_to_hbm [thread:$0]  (%p4505_p10), %s4379_s14, 2048, %s4377_s17, %s2524_s28, %s3531_s1, %s3531_s1, %s3532_s16  }
 0x2bf PF: > { %s2553_s30 = sand.u32 1, %s3508_s24   ;;  %p4506_p1 = scmp.ne.s32.totalorder %s4438_s8, 0 }
 0x2c0   : > { %p4507_p2 = scmp.ge.s32.totalorder %s3520_s27, 2  ;;  %s2554_s9 = scalar_lea.sflag [#allocation5], %s2553_s30 }
 0x2c2   : > { %p3242_p6 = pnand %p4507_p2, %p4506_p1 }
 0x2c4   : > { %p3243_p12 = pneg %p3242_p6 }
 0x2c6   : > { %3503 = dma.done.wait (%p3243_p12), %s2554_s9, 2048  }
 0x2c7   : > { %3505 = vsyncadd (%p3243_p12), %s2554_s9, 4294965248  ;;  %p21_p7 = scmp.ge.s32.totalorder %s3645_s23, 4   ;;  %s4508_s24 = smov %s3512_s25 }
 0x2c8   : > { %s4509_s25 = smov %s3516_s26  ;;  %s4510_s26 = smov %s3661_s12 }
 0x2c9   : > { %s4511_s27 = smov %s3645_s23  ;;  %23 = sbr.rel (!%p21_p7) target bundleno = 8 (0x8), region = 112 }
 0x2ce   :  { %2559 = vsyncpa [#allocation4], 1 }
 0x2cf   :  { %2561 = vsyncpa [#allocation4 + $0x1], 1 }
 0x2d0   :  { %2562 = vsyncpa [#allocation7], 1 }
 0x2d1   :  { %2563 = vsyncpa [#allocation5], 1 }
 0x2d2   :  { %2565 = vsyncpa [#allocation5 + $0x1], 1 }

</bundles_post_ra>
